<compile_context>
chip_gen: v7x
topology: tpu7x:2x2x1
jax: 0.10.0
libtpu: 0.0.40
codegen_flags: <defaults>
</compile_context>

<pallas_src>
import jax
import jax.numpy as jnp
import numpy as np
from jax import lax
from jax.experimental import pallas as pl
from jax.experimental.pallas import tpu as pltpu

BN_EPS = 1e-5


def _basic_block_kernel(x_ref, w1_ref, s1_ref, b1_ref, w2_ref, s2_ref, b2_ref,
                        o_ref, xs_ref, mid_ref):
    """One batch element per grid step.

    x_ref  : (H, W, C)        un-padded input block, f32
    w1_ref : (9, C, P)        conv1 per-tap weights (k = 3*dy + dx), bf16
    s1/b1  : (1, P)           folded BN1 scale / bias, f32
    w2_ref : (9, P, P)        conv2 per-tap weights, bf16
    s2/b2  : (1, P)           folded BN2 scale / bias, f32
    o_ref  : (H*W, P)         output block, f32
    xs_ref : (H+2, W+2, C)    VMEM scratch: zero-padded input, f32
    mid_ref: (H+2, W+2, P)    VMEM scratch: zero-padded conv1 activation, f32
    """
    H, W, C = x_ref.shape
    P = w2_ref.shape[2]
    HW = H * W
    f32, bf16 = jnp.float32, jnp.bfloat16

    # Folded BN params: read once per grid step (hoisted out of all compute).
    s1 = s1_ref[...]
    b1 = b1_ref[...]
    s2 = s2_ref[...]
    b2 = b2_ref[...]

    # In-kernel zero padding.  The scratch buffers are tiny (<=~10 KiB), so we
    # simply zero them fully each grid step (keeps the kernel correct under
    # "parallel" partitioning across TensorCores) and write the interiors.
    xs_ref[...] = jnp.zeros_like(xs_ref)
    mid_ref[...] = jnp.zeros_like(mid_ref)

    xv = x_ref[...]                                    # (H, W, C) f32 residual
    xs_ref[1:H + 1, 1:W + 1, :] = xv

    def conv3x3(src_ref, cc, w_ref):
        """3x3 'same' conv of the padded src scratch: 9 row-batched MXU dots."""
        acc = jnp.zeros((HW, P), f32)
        for dy in range(3):
            for dx in range(3):
                tap = src_ref[dy:dy + H, dx:dx + W, :].reshape(HW, cc)
                acc = acc + jnp.dot(tap.astype(bf16), w_ref[3 * dy + dx],
                                    preferred_element_type=f32)
        return acc

    # ---- conv1 + bn1 + relu (f32 accumulate / BN / relu) ----
    act1 = jnp.maximum(conv3x3(xs_ref, C, w1_ref) * s1 + b1, 0.0)
    mid_ref[1:H + 1, 1:W + 1, :] = act1.reshape(H, W, P)

    # ---- conv2 + bn2 + identity residual + relu ----
    acc2 = conv3x3(mid_ref, P, w2_ref)
    o_ref[...] = jnp.maximum(acc2 * s2 + b2 + xv.reshape(HW, C), 0.0)


def _fold_bn(bn):
    gamma, beta, mean, var = bn
    scale = gamma / jnp.sqrt(var + BN_EPS)
    bias = beta - mean * scale
    return (scale.reshape(1, -1).astype(jnp.float32),
            bias.reshape(1, -1).astype(jnp.float32))


def basic_block_forward(x_nchw, w1, bn1, w2, bn2):
    """x_nchw: (N, C, H, W) float32; w: (O, I, 3, 3) PyTorch layout."""
    N, C, H, W = x_nchw.shape
    P = w1.shape[0]
    assert P == C, "identity residual requires inplanes == planes (downsample=None)"
    HW = H * W

    # NCHW -> NHWC (pure layout glue; no spatial padding copy in HBM).
    x_nhwc = jnp.transpose(x_nchw, (0, 2, 3, 1)).astype(jnp.float32)

    # (O, I, 3, 3) -> (9, I, O): per-tap (C, P) matmul weights, bf16 operands.
    w1r = jnp.transpose(w1, (2, 3, 1, 0)).reshape(9, C, P).astype(jnp.bfloat16)
    w2r = jnp.transpose(w2, (2, 3, 1, 0)).reshape(9, P, P).astype(jnp.bfloat16)
    s1, b1 = _fold_bn(bn1)
    s2, b2 = _fold_bn(bn2)

    out_flat = pl.pallas_call(
        _basic_block_kernel,
        out_shape=jax.ShapeDtypeStruct((N, HW, P), jnp.float32),
        grid_spec=pltpu.PrefetchScalarGridSpec(
            num_scalar_prefetch=0,
            grid=(N,),
            in_specs=[
                pl.BlockSpec((None, H, W, C), lambda n: (n, 0, 0, 0)),  # x
                pl.BlockSpec((9, C, P), lambda n: (0, 0, 0)),           # w1
                pl.BlockSpec((1, P), lambda n: (0, 0)),                 # s1
                pl.BlockSpec((1, P), lambda n: (0, 0)),                 # b1
                pl.BlockSpec((9, P, P), lambda n: (0, 0, 0)),           # w2
                pl.BlockSpec((1, P), lambda n: (0, 0)),                 # s2
                pl.BlockSpec((1, P), lambda n: (0, 0)),                 # b2
            ],
            out_specs=pl.BlockSpec((None, HW, P), lambda n: (n, 0, 0)),
            scratch_shapes=[
                pltpu.VMEM((H + 2, W + 2, C), jnp.float32),   # padded x
                pltpu.VMEM((H + 2, W + 2, P), jnp.float32),   # padded conv1 act
            ],
        ),
        compiler_params=pltpu.CompilerParams(
            dimension_semantics=("parallel",)),   # batch elements independent
    )(x_nhwc, w1r, s1, b1, w2r, s2, b2)

    # (N, H*W, P) -> (N, P, H, W)
    return jnp.transpose(out_flat.reshape(N, H, W, P), (0, 3, 1, 2))


def basic_block_reference(x, w1, bn1, w2, bn2, mxu_bf16=False):
    """Pure-JAX reference of the PyTorch forward (inference-mode BN).

    With mxu_bf16=True the conv operands are rounded to bf16 (accumulating in
    f32), mirroring the kernel's MXU precision.
    """
    cast = (lambda a: a.astype(jnp.bfloat16)) if mxu_bf16 else (lambda a: a)

    def conv(y, w):
        return lax.conv_general_dilated(
            cast(y), cast(w), window_strides=(1, 1), padding=((1, 1), (1, 1)),
            dimension_numbers=('NCHW', 'OIHW', 'NCHW'),
            preferred_element_type=jnp.float32)

    def bn(y, p):
        g, b, m, v = (a[None, :, None, None] for a in p)
        return (y - m) / jnp.sqrt(v + BN_EPS) * g + b

    out = jnp.maximum(bn(conv(x, w1), bn1), 0.0)
    out = bn(conv(out, w2), bn2)
    return jnp.maximum(out + x, 0.0)


if __name__ == "__main__":
    key = jax.random.PRNGKey(0)
    N, C, H, W = 2, 8, 16, 16          # inplanes == planes == 8, stride=1
    P = C
    ks = jax.random.split(key, 11)

    x = jax.random.normal(ks[0], (N, C, H, W), jnp.float32)
    w1 = jax.random.normal(ks[1], (P, C, 3, 3), jnp.float32) * 0.1
    w2 = jax.random.normal(ks[2], (P, P, 3, 3), jnp.float32) * 0.1
    bn1 = (jax.random.uniform(ks[3], (P,), minval=0.5, maxval=1.5),   # gamma
           jax.random.normal(ks[4], (P,), jnp.float32) * 0.1,         # beta
           jax.random.normal(ks[5], (P,), jnp.float32) * 0.1,         # running_mean
           jax.random.uniform(ks[6], (P,), minval=0.5, maxval=1.5))   # running_var
    bn2 = (jax.random.uniform(ks[7], (P,), minval=0.5, maxval=1.5),
           jax.random.normal(ks[8], (P,), jnp.float32) * 0.1,
           jax.random.normal(ks[9], (P,), jnp.float32) * 0.1,
           jax.random.uniform(ks[10], (P,), minval=0.5, maxval=1.5))

    fwd = jax.jit(basic_block_forward)
    out = jax.block_until_ready(fwd(x, w1, bn1, w2, bn2))

    # Tight check against a reference that mirrors the kernel's bf16 MXU
    # operands, plus a looser sanity check against the pure-f32 reference.
    ref_bf16 = basic_block_reference(x, w1, bn1, w2, bn2, mxu_bf16=True)
    ref_f32 = basic_block_reference(x, w1, bn1, w2, bn2, mxu_bf16=False)
    np.testing.assert_allclose(np.asarray(out), np.asarray(ref_bf16),
                               rtol=1e-2, atol=1e-2)
    np.testing.assert_allclose(np.asarray(out), np.asarray(ref_f32),
                               rtol=1e-1, atol=1e-1)
    print("KERNEL_OK")
</pallas_src>

<mosaic_0001>
module attributes {stable_mosaic.version = 11 : i64} {
  func.func @_basic_block_kernel(%arg0: i32, %arg1: memref<1x16x16x8xf32, #tpu.memory_space<vmem>>, %arg2: memref<9x8x8xbf16, #tpu.memory_space<vmem>>, %arg3: memref<1x8xf32, #tpu.memory_space<vmem>>, %arg4: memref<1x8xf32, #tpu.memory_space<vmem>>, %arg5: memref<9x8x8xbf16, #tpu.memory_space<vmem>>, %arg6: memref<1x8xf32, #tpu.memory_space<vmem>>, %arg7: memref<1x8xf32, #tpu.memory_space<vmem>>, %arg8: memref<1x256x8xf32, #tpu.memory_space<vmem>>, %arg9: memref<18x18x8xf32, #tpu.memory_space<vmem>>, %arg10: memref<18x18x8xf32, #tpu.memory_space<vmem>>) attributes {dimension_semantics = [#tpu.dimension_semantics<parallel>], iteration_bounds = array<i64: 2>, scalar_prefetch = 0 : i64, scratch_operands = 2 : i64, tpu.core_type = #tpu.core_type<tc>, window_params = [{transform_indices = @transform_0, window_bounds = array<i64: 1, 16, 16, 8>}, {pipeline_mode = #tpu.pipeline_mode<synchronous>, transform_indices = @transform_1, window_bounds = array<i64: 9, 8, 8>}, {pipeline_mode = #tpu.pipeline_mode<synchronous>, transform_indices = @transform_2, window_bounds = array<i64: 1, 8>}, {pipeline_mode = #tpu.pipeline_mode<synchronous>, transform_indices = @transform_3, window_bounds = array<i64: 1, 8>}, {pipeline_mode = #tpu.pipeline_mode<synchronous>, transform_indices = @transform_4, window_bounds = array<i64: 9, 8, 8>}, {pipeline_mode = #tpu.pipeline_mode<synchronous>, transform_indices = @transform_5, window_bounds = array<i64: 1, 8>}, {pipeline_mode = #tpu.pipeline_mode<synchronous>, transform_indices = @transform_6, window_bounds = array<i64: 1, 8>}, {transform_indices = @transform_7, window_bounds = array<i64: 1, 256, 8>}]} {
    %c0 = arith.constant 0 : index
    %c0_0 = arith.constant 0 : index
    %0 = vector.load %arg3[%c0, %c0_0] : memref<1x8xf32, #tpu.memory_space<vmem>>, vector<1x8xf32>
    %c0_1 = arith.constant 0 : index
    %c0_2 = arith.constant 0 : index
    %1 = vector.load %arg4[%c0_1, %c0_2] : memref<1x8xf32, #tpu.memory_space<vmem>>, vector<1x8xf32>
    %c0_3 = arith.constant 0 : index
    %c0_4 = arith.constant 0 : index
    %2 = vector.load %arg6[%c0_3, %c0_4] : memref<1x8xf32, #tpu.memory_space<vmem>>, vector<1x8xf32>
    %c0_5 = arith.constant 0 : index
    %c0_6 = arith.constant 0 : index
    %3 = vector.load %arg7[%c0_5, %c0_6] : memref<1x8xf32, #tpu.memory_space<vmem>>, vector<1x8xf32>
    %cst = arith.constant 0.000000e+00 : f32
    %4 = vector.broadcast %cst : f32 to vector<18x18x8xf32>
    %c0_7 = arith.constant 0 : index
    %c0_8 = arith.constant 0 : index
    %c0_9 = arith.constant 0 : index
    %5 = vector.load %arg9[%c0_7, %c0_8, %c0_9] : memref<18x18x8xf32, #tpu.memory_space<vmem>>, vector<18x18x8xf32>
    tpu.vector_store %arg9[%c0_7, %c0_8, %c0_9], %4 {strides = array<i32>} : memref<18x18x8xf32, #tpu.memory_space<vmem>>, vector<18x18x8xf32>,
    %cst_10 = arith.constant 0.000000e+00 : f32
    %6 = vector.broadcast %cst_10 : f32 to vector<18x18x8xf32>
    %c0_11 = arith.constant 0 : index
    %c0_12 = arith.constant 0 : index
    %c0_13 = arith.constant 0 : index
    %7 = vector.load %arg10[%c0_11, %c0_12, %c0_13] : memref<18x18x8xf32, #tpu.memory_space<vmem>>, vector<18x18x8xf32>
    tpu.vector_store %arg10[%c0_11, %c0_12, %c0_13], %6 {strides = array<i32>} : memref<18x18x8xf32, #tpu.memory_space<vmem>>, vector<18x18x8xf32>,
    %c0_14 = arith.constant 0 : index
    %c0_15 = arith.constant 0 : index
    %c0_16 = arith.constant 0 : index
    %c0_17 = arith.constant 0 : index
    %8 = vector.load %arg1[%c0_14, %c0_15, %c0_16, %c0_17] : memref<1x16x16x8xf32, #tpu.memory_space<vmem>>, vector<1x16x16x8xf32>
    %9 = vector.shape_cast %8 : vector<1x16x16x8xf32> to vector<16x16x8xf32>
    %c1 = arith.constant 1 : index
    %c1_18 = arith.constant 1 : index
    %c0_19 = arith.constant 0 : index
    %10 = vector.load %arg9[%c1, %c1_18, %c0_19] : memref<18x18x8xf32, #tpu.memory_space<vmem>>, vector<16x16x8xf32>
    tpu.vector_store %arg9[%c1, %c1_18, %c0_19], %9 {strides = array<i32>} : memref<18x18x8xf32, #tpu.memory_space<vmem>>, vector<16x16x8xf32>,
    %cst_20 = arith.constant 0.000000e+00 : f32
    %11 = vector.broadcast %cst_20 : f32 to vector<256x8xf32>
    %c0_21 = arith.constant 0 : index
    %c0_22 = arith.constant 0 : index
    %c0_23 = arith.constant 0 : index
    %12 = vector.load %arg9[%c0_21, %c0_22, %c0_23] : memref<18x18x8xf32, #tpu.memory_space<vmem>>, vector<16x16x8xf32>
    %13 = vector.shape_cast %12 : vector<16x16x8xf32> to vector<256x8xf32>
    %14 = arith.truncf %13 : vector<256x8xf32> to vector<256x8xbf16>
    %c0_24 = arith.constant 0 : index
    %c0_25 = arith.constant 0 : index
    %c0_26 = arith.constant 0 : index
    %15 = vector.load %arg2[%c0_24, %c0_25, %c0_26] : memref<9x8x8xbf16, #tpu.memory_space<vmem>>, vector<1x8x8xbf16>
    %16 = vector.shape_cast %15 : vector<1x8x8xbf16> to vector<8x8xbf16>
    %cst_27 = arith.constant dense<0.000000e+00> : vector<256x8xf32>
    %17 = tpu.matmul %14, %16, %cst_27 {dimension_numbers = #tpu.dot_dimension_numbers<[1], [0], [0], [1], [0, 0, 1, 1], [], []>} : vector<256x8xbf16>, vector<8x8xbf16>, vector<256x8xf32> -> vector<256x8xf32>
    %18 = arith.addf %11, %17 : vector<256x8xf32>
    %c0_28 = arith.constant 0 : index
    %c1_29 = arith.constant 1 : index
    %c0_30 = arith.constant 0 : index
    %19 = vector.load %arg9[%c0_28, %c1_29, %c0_30] : memref<18x18x8xf32, #tpu.memory_space<vmem>>, vector<16x16x8xf32>
    %20 = vector.shape_cast %19 : vector<16x16x8xf32> to vector<256x8xf32>
    %21 = arith.truncf %20 : vector<256x8xf32> to vector<256x8xbf16>
    %c1_31 = arith.constant 1 : index
    %c0_32 = arith.constant 0 : index
    %c0_33 = arith.constant 0 : index
    %22 = vector.load %arg2[%c1_31, %c0_32, %c0_33] : memref<9x8x8xbf16, #tpu.memory_space<vmem>>, vector<1x8x8xbf16>
    %23 = vector.shape_cast %22 : vector<1x8x8xbf16> to vector<8x8xbf16>
    %cst_34 = arith.constant dense<0.000000e+00> : vector<256x8xf32>
    %24 = tpu.matmul %21, %23, %cst_34 {dimension_numbers = #tpu.dot_dimension_numbers<[1], [0], [0], [1], [0, 0, 1, 1], [], []>} : vector<256x8xbf16>, vector<8x8xbf16>, vector<256x8xf32> -> vector<256x8xf32>
    %25 = arith.addf %18, %24 : vector<256x8xf32>
    %c0_35 = arith.constant 0 : index
    %c2 = arith.constant 2 : index
    %c0_36 = arith.constant 0 : index
    %26 = vector.load %arg9[%c0_35, %c2, %c0_36] : memref<18x18x8xf32, #tpu.memory_space<vmem>>, vector<16x16x8xf32>
    %27 = vector.shape_cast %26 : vector<16x16x8xf32> to vector<256x8xf32>
    %28 = arith.truncf %27 : vector<256x8xf32> to vector<256x8xbf16>
    %c2_37 = arith.constant 2 : index
    %c0_38 = arith.constant 0 : index
    %c0_39 = arith.constant 0 : index
    %29 = vector.load %arg2[%c2_37, %c0_38, %c0_39] : memref<9x8x8xbf16, #tpu.memory_space<vmem>>, vector<1x8x8xbf16>
    %30 = vector.shape_cast %29 : vector<1x8x8xbf16> to vector<8x8xbf16>
    %cst_40 = arith.constant dense<0.000000e+00> : vector<256x8xf32>
    %31 = tpu.matmul %28, %30, %cst_40 {dimension_numbers = #tpu.dot_dimension_numbers<[1], [0], [0], [1], [0, 0, 1, 1], [], []>} : vector<256x8xbf16>, vector<8x8xbf16>, vector<256x8xf32> -> vector<256x8xf32>
    %32 = arith.addf %25, %31 : vector<256x8xf32>
    %c1_41 = arith.constant 1 : index
    %c0_42 = arith.constant 0 : index
    %c0_43 = arith.constant 0 : index
    %33 = vector.load %arg9[%c1_41, %c0_42, %c0_43] : memref<18x18x8xf32, #tpu.memory_space<vmem>>, vector<16x16x8xf32>
    %34 = vector.shape_cast %33 : vector<16x16x8xf32> to vector<256x8xf32>
    %35 = arith.truncf %34 : vector<256x8xf32> to vector<256x8xbf16>
    %c3 = arith.constant 3 : index
    %c0_44 = arith.constant 0 : index
    %c0_45 = arith.constant 0 : index
    %36 = vector.load %arg2[%c3, %c0_44, %c0_45] : memref<9x8x8xbf16, #tpu.memory_space<vmem>>, vector<1x8x8xbf16>
    %37 = vector.shape_cast %36 : vector<1x8x8xbf16> to vector<8x8xbf16>
    %cst_46 = arith.constant dense<0.000000e+00> : vector<256x8xf32>
    %38 = tpu.matmul %35, %37, %cst_46 {dimension_numbers = #tpu.dot_dimension_numbers<[1], [0], [0], [1], [0, 0, 1, 1], [], []>} : vector<256x8xbf16>, vector<8x8xbf16>, vector<256x8xf32> -> vector<256x8xf32>
    %39 = arith.addf %32, %38 : vector<256x8xf32>
    %c1_47 = arith.constant 1 : index
    %c1_48 = arith.constant 1 : index
    %c0_49 = arith.constant 0 : index
    %40 = vector.load %arg9[%c1_47, %c1_48, %c0_49] : memref<18x18x8xf32, #tpu.memory_space<vmem>>, vector<16x16x8xf32>
    %41 = vector.shape_cast %40 : vector<16x16x8xf32> to vector<256x8xf32>
    %42 = arith.truncf %41 : vector<256x8xf32> to vector<256x8xbf16>
    %c4 = arith.constant 4 : index
    %c0_50 = arith.constant 0 : index
    %c0_51 = arith.constant 0 : index
    %43 = vector.load %arg2[%c4, %c0_50, %c0_51] : memref<9x8x8xbf16, #tpu.memory_space<vmem>>, vector<1x8x8xbf16>
    %44 = vector.shape_cast %43 : vector<1x8x8xbf16> to vector<8x8xbf16>
    %cst_52 = arith.constant dense<0.000000e+00> : vector<256x8xf32>
    %45 = tpu.matmul %42, %44, %cst_52 {dimension_numbers = #tpu.dot_dimension_numbers<[1], [0], [0], [1], [0, 0, 1, 1], [], []>} : vector<256x8xbf16>, vector<8x8xbf16>, vector<256x8xf32> -> vector<256x8xf32>
    %46 = arith.addf %39, %45 : vector<256x8xf32>
    %c1_53 = arith.constant 1 : index
    %c2_54 = arith.constant 2 : index
    %c0_55 = arith.constant 0 : index
    %47 = vector.load %arg9[%c1_53, %c2_54, %c0_55] : memref<18x18x8xf32, #tpu.memory_space<vmem>>, vector<16x16x8xf32>
    %48 = vector.shape_cast %47 : vector<16x16x8xf32> to vector<256x8xf32>
    %49 = arith.truncf %48 : vector<256x8xf32> to vector<256x8xbf16>
    %c5 = arith.constant 5 : index
    %c0_56 = arith.constant 0 : index
    %c0_57 = arith.constant 0 : index
    %50 = vector.load %arg2[%c5, %c0_56, %c0_57] : memref<9x8x8xbf16, #tpu.memory_space<vmem>>, vector<1x8x8xbf16>
    %51 = vector.shape_cast %50 : vector<1x8x8xbf16> to vector<8x8xbf16>
    %cst_58 = arith.constant dense<0.000000e+00> : vector<256x8xf32>
    %52 = tpu.matmul %49, %51, %cst_58 {dimension_numbers = #tpu.dot_dimension_numbers<[1], [0], [0], [1], [0, 0, 1, 1], [], []>} : vector<256x8xbf16>, vector<8x8xbf16>, vector<256x8xf32> -> vector<256x8xf32>
    %53 = arith.addf %46, %52 : vector<256x8xf32>
    %c2_59 = arith.constant 2 : index
    %c0_60 = arith.constant 0 : index
    %c0_61 = arith.constant 0 : index
    %54 = vector.load %arg9[%c2_59, %c0_60, %c0_61] : memref<18x18x8xf32, #tpu.memory_space<vmem>>, vector<16x16x8xf32>
    %55 = vector.shape_cast %54 : vector<16x16x8xf32> to vector<256x8xf32>
    %56 = arith.truncf %55 : vector<256x8xf32> to vector<256x8xbf16>
    %c6 = arith.constant 6 : index
    %c0_62 = arith.constant 0 : index
    %c0_63 = arith.constant 0 : index
    %57 = vector.load %arg2[%c6, %c0_62, %c0_63] : memref<9x8x8xbf16, #tpu.memory_space<vmem>>, vector<1x8x8xbf16>
    %58 = vector.shape_cast %57 : vector<1x8x8xbf16> to vector<8x8xbf16>
    %cst_64 = arith.constant dense<0.000000e+00> : vector<256x8xf32>
    %59 = tpu.matmul %56, %58, %cst_64 {dimension_numbers = #tpu.dot_dimension_numbers<[1], [0], [0], [1], [0, 0, 1, 1], [], []>} : vector<256x8xbf16>, vector<8x8xbf16>, vector<256x8xf32> -> vector<256x8xf32>
    %60 = arith.addf %53, %59 : vector<256x8xf32>
    %c2_65 = arith.constant 2 : index
    %c1_66 = arith.constant 1 : index
    %c0_67 = arith.constant 0 : index
    %61 = vector.load %arg9[%c2_65, %c1_66, %c0_67] : memref<18x18x8xf32, #tpu.memory_space<vmem>>, vector<16x16x8xf32>
    %62 = vector.shape_cast %61 : vector<16x16x8xf32> to vector<256x8xf32>
    %63 = arith.truncf %62 : vector<256x8xf32> to vector<256x8xbf16>
    %c7 = arith.constant 7 : index
    %c0_68 = arith.constant 0 : index
    %c0_69 = arith.constant 0 : index
    %64 = vector.load %arg2[%c7, %c0_68, %c0_69] : memref<9x8x8xbf16, #tpu.memory_space<vmem>>, vector<1x8x8xbf16>
    %65 = vector.shape_cast %64 : vector<1x8x8xbf16> to vector<8x8xbf16>
    %cst_70 = arith.constant dense<0.000000e+00> : vector<256x8xf32>
    %66 = tpu.matmul %63, %65, %cst_70 {dimension_numbers = #tpu.dot_dimension_numbers<[1], [0], [0], [1], [0, 0, 1, 1], [], []>} : vector<256x8xbf16>, vector<8x8xbf16>, vector<256x8xf32> -> vector<256x8xf32>
    %67 = arith.addf %60, %66 : vector<256x8xf32>
    %c2_71 = arith.constant 2 : index
    %c2_72 = arith.constant 2 : index
    %c0_73 = arith.constant 0 : index
    %68 = vector.load %arg9[%c2_71, %c2_72, %c0_73] : memref<18x18x8xf32, #tpu.memory_space<vmem>>, vector<16x16x8xf32>
    %69 = vector.shape_cast %68 : vector<16x16x8xf32> to vector<256x8xf32>
    %70 = arith.truncf %69 : vector<256x8xf32> to vector<256x8xbf16>
    %c8 = arith.constant 8 : index
    %c0_74 = arith.constant 0 : index
    %c0_75 = arith.constant 0 : index
    %71 = vector.load %arg2[%c8, %c0_74, %c0_75] : memref<9x8x8xbf16, #tpu.memory_space<vmem>>, vector<1x8x8xbf16>
    %72 = vector.shape_cast %71 : vector<1x8x8xbf16> to vector<8x8xbf16>
    %cst_76 = arith.constant dense<0.000000e+00> : vector<256x8xf32>
    %73 = tpu.matmul %70, %72, %cst_76 {dimension_numbers = #tpu.dot_dimension_numbers<[1], [0], [0], [1], [0, 0, 1, 1], [], []>} : vector<256x8xbf16>, vector<8x8xbf16>, vector<256x8xf32> -> vector<256x8xf32>
    %74 = arith.addf %67, %73 : vector<256x8xf32>
    %75 = vector.broadcast %0 : vector<1x8xf32> to vector<256x8xf32>
    %76 = arith.mulf %74, %75 : vector<256x8xf32>
    %77 = vector.broadcast %1 : vector<1x8xf32> to vector<256x8xf32>
    %78 = arith.addf %76, %77 : vector<256x8xf32>
    %cst_77 = arith.constant 0.000000e+00 : f32
    %79 = vector.broadcast %cst_77 : f32 to vector<256x8xf32>
    %80 = arith.maximumf %78, %79 : vector<256x8xf32>
    %81 = vector.shape_cast %80 : vector<256x8xf32> to vector<16x16x8xf32>
    %c1_78 = arith.constant 1 : index
    %c1_79 = arith.constant 1 : index
    %c0_80 = arith.constant 0 : index
    %82 = vector.load %arg10[%c1_78, %c1_79, %c0_80] : memref<18x18x8xf32, #tpu.memory_space<vmem>>, vector<16x16x8xf32>
    tpu.vector_store %arg10[%c1_78, %c1_79, %c0_80], %81 {strides = array<i32>} : memref<18x18x8xf32, #tpu.memory_space<vmem>>, vector<16x16x8xf32>,
    %cst_81 = arith.constant 0.000000e+00 : f32
    %83 = vector.broadcast %cst_81 : f32 to vector<256x8xf32>
    %c0_82 = arith.constant 0 : index
    %c0_83 = arith.constant 0 : index
    %c0_84 = arith.constant 0 : index
    %84 = vector.load %arg10[%c0_82, %c0_83, %c0_84] : memref<18x18x8xf32, #tpu.memory_space<vmem>>, vector<16x16x8xf32>
    %85 = vector.shape_cast %84 : vector<16x16x8xf32> to vector<256x8xf32>
    %86 = arith.truncf %85 : vector<256x8xf32> to vector<256x8xbf16>
    %c0_85 = arith.constant 0 : index
    %c0_86 = arith.constant 0 : index
    %c0_87 = arith.constant 0 : index
    %87 = vector.load %arg5[%c0_85, %c0_86, %c0_87] : memref<9x8x8xbf16, #tpu.memory_space<vmem>>, vector<1x8x8xbf16>
    %88 = vector.shape_cast %87 : vector<1x8x8xbf16> to vector<8x8xbf16>
    %cst_88 = arith.constant dense<0.000000e+00> : vector<256x8xf32>
    %89 = tpu.matmul %86, %88, %cst_88 {dimension_numbers = #tpu.dot_dimension_numbers<[1], [0], [0], [1], [0, 0, 1, 1], [], []>} : vector<256x8xbf16>, vector<8x8xbf16>, vector<256x8xf32> -> vector<256x8xf32>
    %90 = arith.addf %83, %89 : vector<256x8xf32>
    %c0_89 = arith.constant 0 : index
    %c1_90 = arith.constant 1 : index
    %c0_91 = arith.constant 0 : index
    %91 = vector.load %arg10[%c0_89, %c1_90, %c0_91] : memref<18x18x8xf32, #tpu.memory_space<vmem>>, vector<16x16x8xf32>
    %92 = vector.shape_cast %91 : vector<16x16x8xf32> to vector<256x8xf32>
    %93 = arith.truncf %92 : vector<256x8xf32> to vector<256x8xbf16>
    %c1_92 = arith.constant 1 : index
    %c0_93 = arith.constant 0 : index
    %c0_94 = arith.constant 0 : index
    %94 = vector.load %arg5[%c1_92, %c0_93, %c0_94] : memref<9x8x8xbf16, #tpu.memory_space<vmem>>, vector<1x8x8xbf16>
    %95 = vector.shape_cast %94 : vector<1x8x8xbf16> to vector<8x8xbf16>
    %cst_95 = arith.constant dense<0.000000e+00> : vector<256x8xf32>
    %96 = tpu.matmul %93, %95, %cst_95 {dimension_numbers = #tpu.dot_dimension_numbers<[1], [0], [0], [1], [0, 0, 1, 1], [], []>} : vector<256x8xbf16>, vector<8x8xbf16>, vector<256x8xf32> -> vector<256x8xf32>
    %97 = arith.addf %90, %96 : vector<256x8xf32>
    %c0_96 = arith.constant 0 : index
    %c2_97 = arith.constant 2 : index
    %c0_98 = arith.constant 0 : index
    %98 = vector.load %arg10[%c0_96, %c2_97, %c0_98] : memref<18x18x8xf32, #tpu.memory_space<vmem>>, vector<16x16x8xf32>
    %99 = vector.shape_cast %98 : vector<16x16x8xf32> to vector<256x8xf32>
    %100 = arith.truncf %99 : vector<256x8xf32> to vector<256x8xbf16>
    %c2_99 = arith.constant 2 : index
    %c0_100 = arith.constant 0 : index
    %c0_101 = arith.constant 0 : index
    %101 = vector.load %arg5[%c2_99, %c0_100, %c0_101] : memref<9x8x8xbf16, #tpu.memory_space<vmem>>, vector<1x8x8xbf16>
    %102 = vector.shape_cast %101 : vector<1x8x8xbf16> to vector<8x8xbf16>
    %cst_102 = arith.constant dense<0.000000e+00> : vector<256x8xf32>
    %103 = tpu.matmul %100, %102, %cst_102 {dimension_numbers = #tpu.dot_dimension_numbers<[1], [0], [0], [1], [0, 0, 1, 1], [], []>} : vector<256x8xbf16>, vector<8x8xbf16>, vector<256x8xf32> -> vector<256x8xf32>
    %104 = arith.addf %97, %103 : vector<256x8xf32>
    %c1_103 = arith.constant 1 : index
    %c0_104 = arith.constant 0 : index
    %c0_105 = arith.constant 0 : index
    %105 = vector.load %arg10[%c1_103, %c0_104, %c0_105] : memref<18x18x8xf32, #tpu.memory_space<vmem>>, vector<16x16x8xf32>
    %106 = vector.shape_cast %105 : vector<16x16x8xf32> to vector<256x8xf32>
    %107 = arith.truncf %106 : vector<256x8xf32> to vector<256x8xbf16>
    %c3_106 = arith.constant 3 : index
    %c0_107 = arith.constant 0 : index
    %c0_108 = arith.constant 0 : index
    %108 = vector.load %arg5[%c3_106, %c0_107, %c0_108] : memref<9x8x8xbf16, #tpu.memory_space<vmem>>, vector<1x8x8xbf16>
    %109 = vector.shape_cast %108 : vector<1x8x8xbf16> to vector<8x8xbf16>
    %cst_109 = arith.constant dense<0.000000e+00> : vector<256x8xf32>
    %110 = tpu.matmul %107, %109, %cst_109 {dimension_numbers = #tpu.dot_dimension_numbers<[1], [0], [0], [1], [0, 0, 1, 1], [], []>} : vector<256x8xbf16>, vector<8x8xbf16>, vector<256x8xf32> -> vector<256x8xf32>
    %111 = arith.addf %104, %110 : vector<256x8xf32>
    %c1_110 = arith.constant 1 : index
    %c1_111 = arith.constant 1 : index
    %c0_112 = arith.constant 0 : index
    %112 = vector.load %arg10[%c1_110, %c1_111, %c0_112] : memref<18x18x8xf32, #tpu.memory_space<vmem>>, vector<16x16x8xf32>
    %113 = vector.shape_cast %112 : vector<16x16x8xf32> to vector<256x8xf32>
    %114 = arith.truncf %113 : vector<256x8xf32> to vector<256x8xbf16>
    %c4_113 = arith.constant 4 : index
    %c0_114 = arith.constant 0 : index
    %c0_115 = arith.constant 0 : index
    %115 = vector.load %arg5[%c4_113, %c0_114, %c0_115] : memref<9x8x8xbf16, #tpu.memory_space<vmem>>, vector<1x8x8xbf16>
    %116 = vector.shape_cast %115 : vector<1x8x8xbf16> to vector<8x8xbf16>
    %cst_116 = arith.constant dense<0.000000e+00> : vector<256x8xf32>
    %117 = tpu.matmul %114, %116, %cst_116 {dimension_numbers = #tpu.dot_dimension_numbers<[1], [0], [0], [1], [0, 0, 1, 1], [], []>} : vector<256x8xbf16>, vector<8x8xbf16>, vector<256x8xf32> -> vector<256x8xf32>
    %118 = arith.addf %111, %117 : vector<256x8xf32>
    %c1_117 = arith.constant 1 : index
    %c2_118 = arith.constant 2 : index
    %c0_119 = arith.constant 0 : index
    %119 = vector.load %arg10[%c1_117, %c2_118, %c0_119] : memref<18x18x8xf32, #tpu.memory_space<vmem>>, vector<16x16x8xf32>
    %120 = vector.shape_cast %119 : vector<16x16x8xf32> to vector<256x8xf32>
    %121 = arith.truncf %120 : vector<256x8xf32> to vector<256x8xbf16>
    %c5_120 = arith.constant 5 : index
    %c0_121 = arith.constant 0 : index
    %c0_122 = arith.constant 0 : index
    %122 = vector.load %arg5[%c5_120, %c0_121, %c0_122] : memref<9x8x8xbf16, #tpu.memory_space<vmem>>, vector<1x8x8xbf16>
    %123 = vector.shape_cast %122 : vector<1x8x8xbf16> to vector<8x8xbf16>
    %cst_123 = arith.constant dense<0.000000e+00> : vector<256x8xf32>
    %124 = tpu.matmul %121, %123, %cst_123 {dimension_numbers = #tpu.dot_dimension_numbers<[1], [0], [0], [1], [0, 0, 1, 1], [], []>} : vector<256x8xbf16>, vector<8x8xbf16>, vector<256x8xf32> -> vector<256x8xf32>
    %125 = arith.addf %118, %124 : vector<256x8xf32>
    %c2_124 = arith.constant 2 : index
    %c0_125 = arith.constant 0 : index
    %c0_126 = arith.constant 0 : index
    %126 = vector.load %arg10[%c2_124, %c0_125, %c0_126] : memref<18x18x8xf32, #tpu.memory_space<vmem>>, vector<16x16x8xf32>
    %127 = vector.shape_cast %126 : vector<16x16x8xf32> to vector<256x8xf32>
    %128 = arith.truncf %127 : vector<256x8xf32> to vector<256x8xbf16>
    %c6_127 = arith.constant 6 : index
    %c0_128 = arith.constant 0 : index
    %c0_129 = arith.constant 0 : index
    %129 = vector.load %arg5[%c6_127, %c0_128, %c0_129] : memref<9x8x8xbf16, #tpu.memory_space<vmem>>, vector<1x8x8xbf16>
    %130 = vector.shape_cast %129 : vector<1x8x8xbf16> to vector<8x8xbf16>
    %cst_130 = arith.constant dense<0.000000e+00> : vector<256x8xf32>
    %131 = tpu.matmul %128, %130, %cst_130 {dimension_numbers = #tpu.dot_dimension_numbers<[1], [0], [0], [1], [0, 0, 1, 1], [], []>} : vector<256x8xbf16>, vector<8x8xbf16>, vector<256x8xf32> -> vector<256x8xf32>
    %132 = arith.addf %125, %131 : vector<256x8xf32>
    %c2_131 = arith.constant 2 : index
    %c1_132 = arith.constant 1 : index
    %c0_133 = arith.constant 0 : index
    %133 = vector.load %arg10[%c2_131, %c1_132, %c0_133] : memref<18x18x8xf32, #tpu.memory_space<vmem>>, vector<16x16x8xf32>
    %134 = vector.shape_cast %133 : vector<16x16x8xf32> to vector<256x8xf32>
    %135 = arith.truncf %134 : vector<256x8xf32> to vector<256x8xbf16>
    %c7_134 = arith.constant 7 : index
    %c0_135 = arith.constant 0 : index
    %c0_136 = arith.constant 0 : index
    %136 = vector.load %arg5[%c7_134, %c0_135, %c0_136] : memref<9x8x8xbf16, #tpu.memory_space<vmem>>, vector<1x8x8xbf16>
    %137 = vector.shape_cast %136 : vector<1x8x8xbf16> to vector<8x8xbf16>
    %cst_137 = arith.constant dense<0.000000e+00> : vector<256x8xf32>
    %138 = tpu.matmul %135, %137, %cst_137 {dimension_numbers = #tpu.dot_dimension_numbers<[1], [0], [0], [1], [0, 0, 1, 1], [], []>} : vector<256x8xbf16>, vector<8x8xbf16>, vector<256x8xf32> -> vector<256x8xf32>
    %139 = arith.addf %132, %138 : vector<256x8xf32>
    %c2_138 = arith.constant 2 : index
    %c2_139 = arith.constant 2 : index
    %c0_140 = arith.constant 0 : index
    %140 = vector.load %arg10[%c2_138, %c2_139, %c0_140] : memref<18x18x8xf32, #tpu.memory_space<vmem>>, vector<16x16x8xf32>
    %141 = vector.shape_cast %140 : vector<16x16x8xf32> to vector<256x8xf32>
    %142 = arith.truncf %141 : vector<256x8xf32> to vector<256x8xbf16>
    %c8_141 = arith.constant 8 : index
    %c0_142 = arith.constant 0 : index
    %c0_143 = arith.constant 0 : index
    %143 = vector.load %arg5[%c8_141, %c0_142, %c0_143] : memref<9x8x8xbf16, #tpu.memory_space<vmem>>, vector<1x8x8xbf16>
    %144 = vector.shape_cast %143 : vector<1x8x8xbf16> to vector<8x8xbf16>
    %cst_144 = arith.constant dense<0.000000e+00> : vector<256x8xf32>
    %145 = tpu.matmul %142, %144, %cst_144 {dimension_numbers = #tpu.dot_dimension_numbers<[1], [0], [0], [1], [0, 0, 1, 1], [], []>} : vector<256x8xbf16>, vector<8x8xbf16>, vector<256x8xf32> -> vector<256x8xf32>
    %146 = arith.addf %139, %145 : vector<256x8xf32>
    %147 = vector.broadcast %2 : vector<1x8xf32> to vector<256x8xf32>
    %148 = arith.mulf %146, %147 : vector<256x8xf32>
    %149 = vector.broadcast %3 : vector<1x8xf32> to vector<256x8xf32>
    %150 = arith.addf %148, %149 : vector<256x8xf32>
    %151 = vector.shape_cast %9 : vector<16x16x8xf32> to vector<256x8xf32>
    %152 = arith.addf %150, %151 : vector<256x8xf32>
    %cst_145 = arith.constant 0.000000e+00 : f32
    %153 = vector.broadcast %cst_145 : f32 to vector<256x8xf32>
    %154 = arith.maximumf %152, %153 : vector<256x8xf32>
    %c0_146 = arith.constant 0 : index
    %c0_147 = arith.constant 0 : index
    %c0_148 = arith.constant 0 : index
    %155 = vector.load %arg8[%c0_146, %c0_147, %c0_148] : memref<1x256x8xf32, #tpu.memory_space<vmem>>, vector<1x256x8xf32>
    %156 = vector.shape_cast %155 : vector<1x256x8xf32> to vector<256x8xf32>
    %157 = vector.shape_cast %154 : vector<256x8xf32> to vector<1x256x8xf32>
    tpu.vector_store %arg8[%c0_146, %c0_147, %c0_148], %157 {strides = array<i32>} : memref<1x256x8xf32, #tpu.memory_space<vmem>>, vector<1x256x8xf32>,
    return
  }
  func.func @transform_0(%arg0: i32) -> (i32, i32, i32, i32) {
    %c0_i32 = arith.constant 0 : i32
    %c0_i32_0 = arith.constant 0 : i32
    %c0_i32_1 = arith.constant 0 : i32
    %c0_i32_2 = arith.constant 0 : i32
    return %arg0, %c0_i32, %c0_i32_0, %c0_i32_1 : i32, i32, i32, i32
  }
  func.func @transform_1(%arg0: i32) -> (i32, i32, i32) {
    %c0_i32 = arith.constant 0 : i32
    %c0_i32_0 = arith.constant 0 : i32
    %c0_i32_1 = arith.constant 0 : i32
    %c0_i32_2 = arith.constant 0 : i32
    return %c0_i32, %c0_i32_0, %c0_i32_1 : i32, i32, i32
  }
  func.func @transform_2(%arg0: i32) -> (i32, i32) {
    %c0_i32 = arith.constant 0 : i32
    %c0_i32_0 = arith.constant 0 : i32
    %c0_i32_1 = arith.constant 0 : i32
    return %c0_i32, %c0_i32_0 : i32, i32
  }
  func.func @transform_3(%arg0: i32) -> (i32, i32) {
    %c0_i32 = arith.constant 0 : i32
    %c0_i32_0 = arith.constant 0 : i32
    %c0_i32_1 = arith.constant 0 : i32
    return %c0_i32, %c0_i32_0 : i32, i32
  }
  func.func @transform_4(%arg0: i32) -> (i32, i32, i32) {
    %c0_i32 = arith.constant 0 : i32
    %c0_i32_0 = arith.constant 0 : i32
    %c0_i32_1 = arith.constant 0 : i32
    %c0_i32_2 = arith.constant 0 : i32
    return %c0_i32, %c0_i32_0, %c0_i32_1 : i32, i32, i32
  }
  func.func @transform_5(%arg0: i32) -> (i32, i32) {
    %c0_i32 = arith.constant 0 : i32
    %c0_i32_0 = arith.constant 0 : i32
    %c0_i32_1 = arith.constant 0 : i32
    return %c0_i32, %c0_i32_0 : i32, i32
  }
  func.func @transform_6(%arg0: i32) -> (i32, i32) {
    %c0_i32 = arith.constant 0 : i32
    %c0_i32_0 = arith.constant 0 : i32
    %c0_i32_1 = arith.constant 0 : i32
    return %c0_i32, %c0_i32_0 : i32, i32
  }
  func.func @transform_7(%arg0: i32) -> (i32, i32, i32) {
    %c0_i32 = arith.constant 0 : i32
    %c0_i32_0 = arith.constant 0 : i32
    %c0_i32_1 = arith.constant 0 : i32
    return %arg0, %c0_i32, %c0_i32_0 : i32, i32, i32
  }
}

</mosaic_0001>

<bundles_post_ra>
// kernel: basic_block_forward.1
= control target key start
LH: loop header
LB: loop body
LE: loop exit
PB: predicated region body
PF: predicated region fallthrough
CT: control target
= control target key end

     0   :  { %s7819_s24 = smov 0   ;;  %s9360_s0 = inlined_call_operand.vmem [shape: f32[2,16,16,8], index: 0, kind: input, shape index: {}]   ;;  %s9361_s1 = inlined_call_operand.vmem [shape: bf16[9,8,8], index: 1, kind: input, shape index: {}]   ;;  %s9362_s2 = inlined_call_operand.vmem [shape: f32[1,8], index: 2, kind: input, shape index: {}]   ;;  %s9363_s3 = inlined_call_operand.vmem [shape: f32[1,8], index: 3, kind: input, shape index: {}]   ;;  %s9364_s4 = inlined_call_operand.vmem [shape: bf16[9,8,8], index: 4, kind: input, shape index: {}]   ;;  %s9365_s5 = inlined_call_operand.vmem [shape: f32[1,8], index: 5, kind: input, shape index: {}]   ;;  %s9366_s6 = inlined_call_operand.vmem [shape: f32[1,8], index: 6, kind: input, shape index: {}]   ;;  %s9367_s7 = inlined_call_operand.vmem [shape: f32[2,256,8], index: 7, kind: output, shape index: {}]  }
   0x1 LB: > { %s5992_s25 = sadd.s32 4294967295, %s7776_s24   ;;  %p5996_p0 = scmp.ge.s32.totalorder %s7776_s24, 1  ;;  %s7776_s24 = sphi %s7819_s24, %s17_s24  }
   0x2   : > { %p237_p1 = scmp.lt.s32.totalorder %s7776_s24, 3 }
   0x4   : > { %p238_p2 = pnand %p5996_p0, %p237_p1 }
   0x6   : > { %241 = sbr.rel (%p238_p2) target bundleno = 1613 (0x64d), region = 48 }
   0xd   : > { %v6001_v0 = vld [vmem:[%s9361_s1 + $0x4] sm:$0xf]  ;;  %vm606_vm0 = vcmask 1043456   ;;  %vm284_vm1 = vcmask 64512   ;;  %vm287_vm2 = vcmask 58368   ;;  %v7778_v2 = vmov 0.0  }
   0xe   : > { %7743 = vmatprep.subr.msk.bf16.mxu0 %vm606_vm0, %v6001_v0  ;;  %v7832_v1 = vsel %vm606_vm0, %v6001_v0, 0  ;;  %285 = vst.msk [vmem:[#allocation2] sm:$0xff] %vm284_vm1, %v7778_v2  ;;  %286 = vst.msk [vmem:[#allocation2 + $0x8] sm:$0xff] %vm284_vm1, %v7778_v2  ;;  %v507_v3 = vld [vmem:[%s9361_s1] sm:$0xf]  ;;  %p269_p3 = scmp.lt.s32.totalorder %s5992_s25, 1 }
   0xf   : > { %288 = vst.msk [vmem:[#allocation2 + $0x10] sm:$0x3] %vm287_vm2, %v7778_v2  ;;  %291 = vst.msk [vmem:[#allocation2 + $0x28] sm:$0x3] %vm287_vm2, %v7778_v2  ;;  %6620 = vmatpush3.bf16.msra.mxu0 %v7832_v1  ;;  %v820_v33 = vsel %vm606_vm0, %v507_v3, 0 }
  0x10   : > { %289 = vst.msk [vmem:[#allocation2 + $0x18] sm:$0xff] %vm284_vm1, %v7778_v2  ;;  %290 = vst.msk [vmem:[#allocation2 + $0x20] sm:$0xff] %vm284_vm1, %v7778_v2  ;;  %7744 = vmatprep.subr.msk.bf16.mxu0 %vm606_vm0, %v507_v3  ;;  %s9432_s25 = smov (!%p269_p3, %s5992_s25), 1  ;;  %v8198_v38 = vld [vmem:[%s9361_s1 + $0x8] sm:$0xf] }
  0x11   : > { %292 = vst.msk [vmem:[#allocation2 + $0x30] sm:$0xff] %vm284_vm1, %v7778_v2  ;;  %293 = vst.msk [vmem:[#allocation2 + $0x38] sm:$0xff] %vm284_vm1, %v7778_v2  ;;  %s6311_s30 = sshll.u32 %s9432_s25, 8 }
  0x12   : > { %294 = vst.msk [vmem:[#allocation2 + $0x40] sm:$0x3] %vm287_vm2, %v7778_v2  ;;  %297 = vst.msk [vmem:[#allocation2 + $0x58] sm:$0x3] %vm287_vm2, %v7778_v2  ;;  %s8067_s10 = scalar_lea.vmem %s9360_s0, %s6311_s30  ;;  %s9203_s13 = scalar_lea.vmem %s9367_s7, %s6311_s30 }
  0x13   : > { %295 = vst.msk [vmem:[#allocation2 + $0x48] sm:$0xff] %vm284_vm1, %v7778_v2  ;;  %296 = vst.msk [vmem:[#allocation2 + $0x50] sm:$0xff] %vm284_vm1, %v7778_v2  ;;  %v8070_v4 = vld [vmem:[%s8067_s10] sm:$0xff]  ;;  %v8073_v5 = vld [vmem:[%s8067_s10 + $0x8] sm:$0xff] }
  0x14   : > { %298 = vst.msk [vmem:[#allocation2 + $0x60] sm:$0xff] %vm284_vm1, %v7778_v2  ;;  %299 = vst.msk [vmem:[#allocation2 + $0x68] sm:$0xff] %vm284_vm1, %v7778_v2  ;;  %v8076_v6 = vld [vmem:[%s8067_s10 + $0x10] sm:$0xff]  ;;  %v8083_v9 = vld [vmem:[%s8067_s10 + $0x18] sm:$0xff] }
  0x15   : > { %300 = vst.msk [vmem:[#allocation2 + $0x70] sm:$0x3] %vm287_vm2, %v7778_v2  ;;  %303 = vst.msk [vmem:[#allocation2 + $0x88] sm:$0x3] %vm287_vm2, %v7778_v2  ;;  %v508_v7 = vld [vmem:[#allocation2 + $0x1] sm:$0xff]  ;;  %v8096_v13 = vld [vmem:[%s8067_s10 + $0x30] sm:$0xff] }
  0x16   : > { %301 = vst.msk [vmem:[#allocation2 + $0x78] sm:$0xff] %vm284_vm1, %v7778_v2  ;;  %302 = vst.msk [vmem:[#allocation2 + $0x80] sm:$0xff] %vm284_vm1, %v7778_v2  ;;  %v509_v8 = vld [vmem:[#allocation2 + $0x9] sm:$0xff]  ;;  %v8090_v11 = vld [vmem:[%s8067_s10 + $0x20] sm:$0xff] }
  0x17   : > { %304 = vst.msk [vmem:[#allocation2 + $0x90] sm:$0xff] %vm284_vm1, %v7778_v2  ;;  %305 = vst.msk [vmem:[#allocation2 + $0x98] sm:$0xff] %vm284_vm1, %v7778_v2  ;;  %v540_v10 = vpack.c.bf16 %v509_v8, %v508_v7  ;;  %v8093_v12 = vld [vmem:[%s8067_s10 + $0x28] sm:$0xff]  ;;  %v8103_v14 = vld [vmem:[%s8067_s10 + $0x38] sm:$0xff] }
  0x18   : > { %306 = vst.msk [vmem:[#allocation2 + $0xa0] sm:$0x3] %vm287_vm2, %v7778_v2  ;;  %309 = vst.msk [vmem:[#allocation2 + $0xb8] sm:$0x3] %vm287_vm2, %v7778_v2  ;;  %v8108_v15 = vld [vmem:[%s8067_s10 + $0x40] sm:$0xff]  ;;  %v8111_v16 = vld [vmem:[%s8067_s10 + $0x48] sm:$0xff] }
  0x19   : > { %307 = vst.msk [vmem:[#allocation2 + $0xa8] sm:$0xff] %vm284_vm1, %v7778_v2  ;;  %308 = vst.msk [vmem:[#allocation2 + $0xb0] sm:$0xff] %vm284_vm1, %v7778_v2  ;;  %6621 = vmatprep.mubr.msk.bf16.mxu0 %vm284_vm1, %v540_v10  ;;  %v8121_v17 = vld [vmem:[%s8067_s10 + $0x50] sm:$0xff]  ;;  %v8124_v18 = vld [vmem:[%s8067_s10 + $0x58] sm:$0xff] }
  0x1a   : > { %310 = vst.msk [vmem:[#allocation2 + $0xc0] sm:$0xff] %vm284_vm1, %v7778_v2  ;;  %311 = vst.msk [vmem:[#allocation2 + $0xc8] sm:$0xff] %vm284_vm1, %v7778_v2  ;;  %v8127_v19 = vld [vmem:[%s8067_s10 + $0x60] sm:$0xff]  ;;  %v8134_v20 = vld [vmem:[%s8067_s10 + $0x68] sm:$0xff] }
  0x1b   : > { %312 = vst.msk [vmem:[#allocation2 + $0xd0] sm:$0x3] %vm287_vm2, %v7778_v2  ;;  %315 = vst.msk [vmem:[#allocation2 + $0xe8] sm:$0x3] %vm287_vm2, %v7778_v2  ;;  %v8139_v21 = vld [vmem:[%s8067_s10 + $0x70] sm:$0xff]  ;;  %v8142_v22 = vld [vmem:[%s8067_s10 + $0x78] sm:$0xff] }
  0x1c   : > { %313 = vst.msk [vmem:[#allocation2 + $0xd8] sm:$0xff] %vm284_vm1, %v7778_v2  ;;  %314 = vst.msk [vmem:[#allocation2 + $0xe0] sm:$0xff] %vm284_vm1, %v7778_v2  ;;  %v8151_v23 = vld [vmem:[%s8067_s10 + $0x80] sm:$0xff]  ;;  %v8154_v24 = vld [vmem:[%s8067_s10 + $0x88] sm:$0xff] }
  0x1d   : > { %316 = vst.msk [vmem:[#allocation2 + $0xf0] sm:$0xff] %vm284_vm1, %v7778_v2  ;;  %317 = vst.msk [vmem:[#allocation2 + $0xf8] sm:$0xff] %vm284_vm1, %v7778_v2  ;;  %v8157_v25 = vld [vmem:[%s8067_s10 + $0x90] sm:$0xff]  ;;  %v8164_v26 = vld [vmem:[%s8067_s10 + $0x98] sm:$0xff] }
  0x1e   : > { %318 = vst.msk [vmem:[#allocation2 + $0x100] sm:$0x3] %vm287_vm2, %v7778_v2  ;;  %321 = vst.msk [vmem:[#allocation2 + $0x118] sm:$0x3] %vm287_vm2, %v7778_v2  ;;  %v8169_v27 = vld [vmem:[%s8067_s10 + $0xa0] sm:$0xff]  ;;  %v8172_v28 = vld [vmem:[%s8067_s10 + $0xa8] sm:$0xff] }
  0x1f   : > { %319 = vst.msk [vmem:[#allocation2 + $0x108] sm:$0xff] %vm284_vm1, %v7778_v2  ;;  %320 = vst.msk [vmem:[#allocation2 + $0x110] sm:$0xff] %vm284_vm1, %v7778_v2  ;;  %v8184_v35 = vld [vmem:[%s8067_s10 + $0xb0] sm:$0xff]  ;;  %v8187_v36 = vld [vmem:[%s8067_s10 + $0xb8] sm:$0xff] }
  0x20   : > { %322 = vst.msk [vmem:[#allocation2 + $0x120] sm:$0xff] %vm284_vm1, %v7778_v2  ;;  %323 = vst.msk [vmem:[#allocation2 + $0x128] sm:$0xff] %vm284_vm1, %v7778_v2  ;;  %v8211_v45 = vld [vmem:[%s8067_s10 + $0xc0] sm:$0xff]  ;;  %v8214_v46 = vld [vmem:[%s8067_s10 + $0xc8] sm:$0xff] }
  0x21   : > { %324 = vst.msk [vmem:[#allocation2 + $0x130] sm:$0x3] %vm287_vm2, %v7778_v2  ;;  %327 = vst.msk [vmem:[#allocation2 + $0x148] sm:$0x3] %vm287_vm2, %v7778_v2  ;;  %v8217_v47 = vld [vmem:[%s8067_s10 + $0xd0] sm:$0xff]  ;;  %v8224_v48 = vld [vmem:[%s8067_s10 + $0xd8] sm:$0xff] }
  0x22   : > { %325 = vst.msk [vmem:[#allocation2 + $0x138] sm:$0xff] %vm284_vm1, %v7778_v2  ;;  %326 = vst.msk [vmem:[#allocation2 + $0x140] sm:$0xff] %vm284_vm1, %v7778_v2  ;;  %v8231_v49 = vld [vmem:[%s8067_s10 + $0xe0] sm:$0xff]  ;;  %v8234_v50 = vld [vmem:[%s8067_s10 + $0xe8] sm:$0xff] }
  0x23   : > { %328 = vst.msk [vmem:[#allocation2 + $0x150] sm:$0xff] %vm284_vm1, %v7778_v2  ;;  %329 = vst.msk [vmem:[#allocation2 + $0x158] sm:$0xff] %vm284_vm1, %v7778_v2 }
  0x24   : > { %330 = vst.msk [vmem:[#allocation2 + $0x160] sm:$0x3] %vm287_vm2, %v7778_v2  ;;  %333 = vst.msk [vmem:[#allocation2 + $0x178] sm:$0x3] %vm287_vm2, %v7778_v2 }
  0x25   : > { %331 = vst.msk [vmem:[#allocation2 + $0x168] sm:$0xff] %vm284_vm1, %v7778_v2  ;;  %332 = vst.msk [vmem:[#allocation2 + $0x170] sm:$0xff] %vm284_vm1, %v7778_v2 }
  0x26   : > { %334 = vst.msk [vmem:[#allocation2 + $0x180] sm:$0xff] %vm284_vm1, %v7778_v2  ;;  %335 = vst.msk [vmem:[#allocation2 + $0x188] sm:$0xff] %vm284_vm1, %v7778_v2 }
  0x27   : > { %336 = vst.msk [vmem:[#allocation2 + $0x190] sm:$0x3] %vm287_vm2, %v7778_v2  ;;  %339 = vst.msk [vmem:[#allocation2 + $0x1a8] sm:$0x3] %vm287_vm2, %v7778_v2 }
  0x28   : > { %337 = vst.msk [vmem:[#allocation2 + $0x198] sm:$0xff] %vm284_vm1, %v7778_v2  ;;  %338 = vst.msk [vmem:[#allocation2 + $0x1a0] sm:$0xff] %vm284_vm1, %v7778_v2 }
  0x29   : > { %340 = vst.msk [vmem:[#allocation3] sm:$0xff] %vm284_vm1, %v7778_v2  ;;  %341 = vst.msk [vmem:[#allocation3 + $0x8] sm:$0xff] %vm284_vm1, %v7778_v2 }
  0x2a   : > { %342 = vst.msk [vmem:[#allocation3 + $0x10] sm:$0x3] %vm287_vm2, %v7778_v2  ;;  %345 = vst.msk [vmem:[#allocation3 + $0x28] sm:$0x3] %vm287_vm2, %v7778_v2 }
  0x2b   : > { %343 = vst.msk [vmem:[#allocation3 + $0x18] sm:$0xff] %vm284_vm1, %v7778_v2  ;;  %344 = vst.msk [vmem:[#allocation3 + $0x20] sm:$0xff] %vm284_vm1, %v7778_v2 }
  0x2c   : > { %346 = vst.msk [vmem:[#allocation3 + $0x30] sm:$0xff] %vm284_vm1, %v7778_v2  ;;  %347 = vst.msk [vmem:[#allocation3 + $0x38] sm:$0xff] %vm284_vm1, %v7778_v2 }
  0x2d   : > { %348 = vst.msk [vmem:[#allocation3 + $0x40] sm:$0x3] %vm287_vm2, %v7778_v2  ;;  %351 = vst.msk [vmem:[#allocation3 + $0x58] sm:$0x3] %vm287_vm2, %v7778_v2 }
  0x2e   : > { %349 = vst.msk [vmem:[#allocation3 + $0x48] sm:$0xff] %vm284_vm1, %v7778_v2  ;;  %350 = vst.msk [vmem:[#allocation3 + $0x50] sm:$0xff] %vm284_vm1, %v7778_v2 }
  0x2f   : > { %352 = vst.msk [vmem:[#allocation3 + $0x60] sm:$0xff] %vm284_vm1, %v7778_v2  ;;  %353 = vst.msk [vmem:[#allocation3 + $0x68] sm:$0xff] %vm284_vm1, %v7778_v2 }
  0x30   : > { %354 = vst.msk [vmem:[#allocation3 + $0x70] sm:$0x3] %vm287_vm2, %v7778_v2  ;;  %357 = vst.msk [vmem:[#allocation3 + $0x88] sm:$0x3] %vm287_vm2, %v7778_v2 }
  0x31   : > { %355 = vst.msk [vmem:[#allocation3 + $0x78] sm:$0xff] %vm284_vm1, %v7778_v2  ;;  %356 = vst.msk [vmem:[#allocation3 + $0x80] sm:$0xff] %vm284_vm1, %v7778_v2 }
  0x32   : > { %358 = vst.msk [vmem:[#allocation3 + $0x90] sm:$0xff] %vm284_vm1, %v7778_v2  ;;  %359 = vst.msk [vmem:[#allocation3 + $0x98] sm:$0xff] %vm284_vm1, %v7778_v2 }
  0x33   : > { %360 = vst.msk [vmem:[#allocation3 + $0xa0] sm:$0x3] %vm287_vm2, %v7778_v2  ;;  %363 = vst.msk [vmem:[#allocation3 + $0xb8] sm:$0x3] %vm287_vm2, %v7778_v2 }
  0x34   : > { %361 = vst.msk [vmem:[#allocation3 + $0xa8] sm:$0xff] %vm284_vm1, %v7778_v2  ;;  %362 = vst.msk [vmem:[#allocation3 + $0xb0] sm:$0xff] %vm284_vm1, %v7778_v2 }
  0x35   : > { %364 = vst.msk [vmem:[#allocation3 + $0xc0] sm:$0xff] %vm284_vm1, %v7778_v2  ;;  %365 = vst.msk [vmem:[#allocation3 + $0xc8] sm:$0xff] %vm284_vm1, %v7778_v2 }
  0x36   : > { %366 = vst.msk [vmem:[#allocation3 + $0xd0] sm:$0x3] %vm287_vm2, %v7778_v2  ;;  %369 = vst.msk [vmem:[#allocation3 + $0xe8] sm:$0x3] %vm287_vm2, %v7778_v2 }
  0x37   : > { %367 = vst.msk [vmem:[#allocation3 + $0xd8] sm:$0xff] %vm284_vm1, %v7778_v2  ;;  %368 = vst.msk [vmem:[#allocation3 + $0xe0] sm:$0xff] %vm284_vm1, %v7778_v2 }
  0x38   : > { %370 = vst.msk [vmem:[#allocation3 + $0xf0] sm:$0xff] %vm284_vm1, %v7778_v2  ;;  %371 = vst.msk [vmem:[#allocation3 + $0xf8] sm:$0xff] %vm284_vm1, %v7778_v2 }
  0x39   : > { %372 = vst.msk [vmem:[#allocation3 + $0x100] sm:$0x3] %vm287_vm2, %v7778_v2  ;;  %375 = vst.msk [vmem:[#allocation3 + $0x118] sm:$0x3] %vm287_vm2, %v7778_v2 }
  0x3a   : > { %373 = vst.msk [vmem:[#allocation3 + $0x108] sm:$0xff] %vm284_vm1, %v7778_v2  ;;  %374 = vst.msk [vmem:[#allocation3 + $0x110] sm:$0xff] %vm284_vm1, %v7778_v2 }
  0x3b   : > { %376 = vst.msk [vmem:[#allocation3 + $0x120] sm:$0xff] %vm284_vm1, %v7778_v2  ;;  %377 = vst.msk [vmem:[#allocation3 + $0x128] sm:$0xff] %vm284_vm1, %v7778_v2 }
  0x3c   : > { %378 = vst.msk [vmem:[#allocation3 + $0x130] sm:$0x3] %vm287_vm2, %v7778_v2  ;;  %381 = vst.msk [vmem:[#allocation3 + $0x148] sm:$0x3] %vm287_vm2, %v7778_v2 }
  0x3d   : > { %379 = vst.msk [vmem:[#allocation3 + $0x138] sm:$0xff] %vm284_vm1, %v7778_v2  ;;  %380 = vst.msk [vmem:[#allocation3 + $0x140] sm:$0xff] %vm284_vm1, %v7778_v2 }
  0x3e   : > { %382 = vst.msk [vmem:[#allocation3 + $0x150] sm:$0xff] %vm284_vm1, %v7778_v2  ;;  %383 = vst.msk [vmem:[#allocation3 + $0x158] sm:$0xff] %vm284_vm1, %v7778_v2 }
  0x3f   : > { %384 = vst.msk [vmem:[#allocation3 + $0x160] sm:$0x3] %vm287_vm2, %v7778_v2  ;;  %387 = vst.msk [vmem:[#allocation3 + $0x178] sm:$0x3] %vm287_vm2, %v7778_v2 }
  0x40   : > { %385 = vst.msk [vmem:[#allocation3 + $0x168] sm:$0xff] %vm284_vm1, %v7778_v2  ;;  %386 = vst.msk [vmem:[#allocation3 + $0x170] sm:$0xff] %vm284_vm1, %v7778_v2 }
  0x41   : > { %388 = vst.msk [vmem:[#allocation3 + $0x180] sm:$0xff] %vm284_vm1, %v7778_v2  ;;  %389 = vst.msk [vmem:[#allocation3 + $0x188] sm:$0xff] %vm284_vm1, %v7778_v2 }
  0x42   : > { %390 = vst.msk [vmem:[#allocation3 + $0x190] sm:$0x3] %vm287_vm2, %v7778_v2  ;;  %393 = vst.msk [vmem:[#allocation3 + $0x1a8] sm:$0x3] %vm287_vm2, %v7778_v2 }
  0x43   : > { %391 = vst.msk [vmem:[#allocation3 + $0x198] sm:$0xff] %vm284_vm1, %v7778_v2  ;;  %392 = vst.msk [vmem:[#allocation3 + $0x1a0] sm:$0xff] %vm284_vm1, %v7778_v2 }
  0x44   : > { %427 = vst.msk [vmem:[#allocation2 + $0x19] sm:$0xff] %vm284_vm1, %v8070_v4  ;;  %428 = vst.msk [vmem:[#allocation2 + $0x21] sm:$0xff] %vm284_vm1, %v8073_v5 }
  0x45   : > { %429 = vst.msk [vmem:[#allocation2 + $0x31] sm:$0xff] %vm284_vm1, %v8076_v6  ;;  %430 = vst.msk [vmem:[#allocation2 + $0x39] sm:$0xff] %vm284_vm1, %v8083_v9 }
  0x46   : > { %431 = vst.msk [vmem:[#allocation2 + $0x49] sm:$0xff] %vm284_vm1, %v8090_v11  ;;  %432 = vst.msk [vmem:[#allocation2 + $0x51] sm:$0xff] %vm284_vm1, %v8093_v12 }
  0x47   : > { %433 = vst.msk [vmem:[#allocation2 + $0x61] sm:$0xff] %vm284_vm1, %v8096_v13  ;;  %9389 = vst [vmem:[#allocation4_spill] sm:$0xff] %v8111_v16 }
  0x48   : > { %434 = vst.msk [vmem:[#allocation2 + $0x69] sm:$0xff] %vm284_vm1, %v8103_v14  ;;  %435 = vst.msk [vmem:[#allocation2 + $0x79] sm:$0xff] %vm284_vm1, %v8108_v15 }
  0x49   : > { %436 = vst.msk [vmem:[#allocation2 + $0x81] sm:$0xff] %vm284_vm1, %v8111_v16  ;;  %9390 = vst [vmem:[#allocation5_spill] sm:$0xff] %v8127_v19 }
  0x4a   : > { %437 = vst.msk [vmem:[#allocation2 + $0x91] sm:$0xff] %vm284_vm1, %v8121_v17  ;;  %438 = vst.msk [vmem:[#allocation2 + $0x99] sm:$0xff] %vm284_vm1, %v8124_v18 }
  0x4b   : > { %9391 = vst [vmem:[#allocation6_spill] sm:$0xff] %v8134_v20  ;;  %439 = vst.msk [vmem:[#allocation2 + $0xa9] sm:$0xff] %vm284_vm1, %v8127_v19  ;;  %v510_v29 = vld [vmem:[#allocation2 + $0x19] sm:$0xff]  ;;  %v511_v30 = vld [vmem:[#allocation2 + $0x21] sm:$0xff] }
  0x4c   : > { %9392 = vst [vmem:[#allocation7_spill] sm:$0xff] %v8139_v21  ;;  %9393 = vst [vmem:[#allocation8_spill] sm:$0xff] %v8142_v22  ;;  %v512_v31 = vld [vmem:[#allocation2 + $0x31] sm:$0xff]  ;;  %v8180_v32 = vpack.c.bf16 %v511_v30, %v510_v29  ;;  %v513_v34 = vld [vmem:[#allocation2 + $0x39] sm:$0xff] }
  0x4d   : > { %440 = vst.msk [vmem:[#allocation2 + $0xb1] sm:$0xff] %vm284_vm1, %v8134_v20  ;;  %441 = vst.msk [vmem:[#allocation2 + $0xc1] sm:$0xff] %vm284_vm1, %v8139_v21  ;;  %v8189_v37 = vpack.c.bf16 %v513_v34, %v512_v31  ;;  %v514_v39 = vld [vmem:[#allocation2 + $0x49] sm:$0xff]  ;;  %v515_v40 = vld [vmem:[#allocation2 + $0x51] sm:$0xff] }
  0x4e   : > { %442 = vst.msk [vmem:[#allocation2 + $0xc9] sm:$0xff] %vm284_vm1, %v8142_v22  ;;  %9394 = vst [vmem:[#allocation9_spill] sm:$0xff] %v8151_v23  ;;  %6622 = vmatmul.mubr.msk.bf16.vlgmr.msra.gmra.mrb[0].mxu0 %vm284_vm1, %v8180_v32  ;;  %v516_v41 = vld [vmem:[#allocation2 + $0x61] sm:$0xff]  ;;  %v8206_v43 = vpack.c.bf16 %v515_v40, %v514_v39 }
  0x4f   : > { %9395 = vst [vmem:[#allocation10_spill] sm:$0xff] %v8154_v24  ;;  %9396 = vst [vmem:[#allocation11_spill] sm:$0xff] %v8157_v25  ;;  %6654 = vmatpush3.bf16.msra.mxu0 %v820_v33  ;;  %6625 = vmatprep.mubr.msk.bf16.mxu0 %vm284_vm1, %v8189_v37  ;;  %v517_v42 = vld [vmem:[#allocation2 + $0x69] sm:$0xff]  ;;  %v518_v51 = vld [vmem:[#allocation2 + $0x79] sm:$0xff] }
  0x50   : > { %443 = vst.msk [vmem:[#allocation2 + $0xd9] sm:$0xff] %vm284_vm1, %v8151_v23  ;;  %444 = vst.msk [vmem:[#allocation2 + $0xe1] sm:$0xff] %vm284_vm1, %v8154_v24  ;;  %7745 = vmatprep.subr.msk.bf16.mxu0 %vm606_vm0, %v8198_v38  ;;  %v8208_v44 = vpack.c.bf16 %v517_v42, %v516_v41  ;;  %v519_v52 = vld [vmem:[#allocation2 + $0x81] sm:$0xff] }
  0x51   : > { %9397 = vst [vmem:[#allocation12_spill] sm:$0xff] %v8164_v26  ;;  %445 = vst.msk [vmem:[#allocation2 + $0xf1] sm:$0xff] %vm284_vm1, %v8157_v25  ;;  %v520_v53 = vld [vmem:[#allocation2 + $0x91] sm:$0xff]  ;;  %v521_v54 = vld [vmem:[#allocation2 + $0x99] sm:$0xff]  ;;  %v8244_v55 = vpack.c.bf16 %v519_v52, %v518_v51 }
  0x52   : > { %9398 = vst [vmem:[#allocation13_spill] sm:$0xff] %v8169_v27  ;;  %9399 = vst [vmem:[#allocation14_spill] sm:$0xff] %v8172_v28  ;;  %v8246_v56 = vpack.c.bf16 %v521_v54, %v520_v53  ;;  %v522_v57 = vld [vmem:[#allocation2 + $0xa9] sm:$0xff]  ;;  %v459_v54 = vld [vmem:[#allocation2] sm:$0xff] }
  0x53   : > { %446 = vst.msk [vmem:[#allocation2 + $0xf9] sm:$0xff] %vm284_vm1, %v8164_v26  ;;  %447 = vst.msk [vmem:[#allocation2 + $0x109] sm:$0xff] %vm284_vm1, %v8169_v27 }
  0x54   : > { %448 = vst.msk [vmem:[#allocation2 + $0x111] sm:$0xff] %vm284_vm1, %v8172_v28  ;;  %9400 = vst [vmem:[#allocation15_spill] sm:$0xff] %v8184_v35  ;;  %v523_v58 = vld [vmem:[#allocation2 + $0xb1] sm:$0xff]  ;;  %v524_v59 = vld [vmem:[#allocation2 + $0xc1] sm:$0xff] }
  0x55   : > { %9401 = vst [vmem:[#allocation16_spill] sm:$0xff] %v8187_v36  ;;  %449 = vst.msk [vmem:[#allocation2 + $0x121] sm:$0xff] %vm284_vm1, %v8184_v35  ;;  %v525_v60 = vld [vmem:[#allocation2 + $0xc9] sm:$0xff]  ;;  %v8252_v61 = vpack.c.bf16 %v523_v58, %v522_v57 }
  0x56   : > { %450 = vst.msk [vmem:[#allocation2 + $0x129] sm:$0xff] %vm284_vm1, %v8187_v36  ;;  %9402 = vst [vmem:[#allocation17_spill] sm:$0xff] %v8211_v45  ;;  %6626 = vmatmul.mubr.msk.bf16.gmra.mrb[4].mxu0 %vm284_vm1, %v8206_v43  ;;  %v8254_v62 = vpack.c.bf16 %v525_v60, %v524_v59  ;;  %v460_v57 = vld [vmem:[#allocation2 + $0x8] sm:$0xff]  ;;  %v461_v60 = vld [vmem:[#allocation2 + $0x18] sm:$0xff] }
  0x57   : > { %9403 = vst [vmem:[#allocation18_spill] sm:$0xff] %v8214_v46  ;;  %9404 = vst [vmem:[#allocation19_spill] sm:$0xff] %v8217_v47  ;;  %6629 = vmatprep.mubr.msk.bf16.mxu0 %vm284_vm1, %v8208_v44  ;;  %v526_v63 = vld [vmem:[#allocation2 + $0xd9] sm:$0xff]  ;;  %v527_v0 = vld [vmem:[#allocation2 + $0xe1] sm:$0xff]  ;;  %v491_v59 = vpack.c.bf16 %v460_v57, %v459_v54 }
  0x58   : > { %451 = vst.msk [vmem:[#allocation2 + $0x139] sm:$0xff] %vm284_vm1, %v8211_v45  ;;  %452 = vst.msk [vmem:[#allocation2 + $0x141] sm:$0xff] %vm284_vm1, %v8214_v46  ;;  %v528_v1 = vld [vmem:[#allocation2 + $0xf1] sm:$0xff]  ;;  %v8260_v3 = vpack.c.bf16 %v527_v0, %v526_v63  ;;  %v462_v63 = vld [vmem:[#allocation2 + $0x20] sm:$0xff] }
  0x59   : > { %9405 = vst [vmem:[#allocation20_spill] sm:$0xff] %v8224_v48  ;;  %453 = vst.msk [vmem:[#allocation2 + $0x151] sm:$0xff] %vm284_vm1, %v8217_v47  ;;  %v463_v0 = vld [vmem:[#allocation2 + $0x30] sm:$0xff]  ;;  %v472_v57 = vld [vmem:[#allocation2 + $0x98] sm:$0xff] }
  0x5a   : > { %454 = vst.msk [vmem:[#allocation2 + $0x159] sm:$0xff] %vm284_vm1, %v8224_v48  ;;  %9406 = vst [vmem:[#allocation21_spill] sm:$0xff] %v8231_v49  ;;  %v529_v2 = vld [vmem:[#allocation2 + $0xf9] sm:$0xff]  ;;  %v530_v8 = vld [vmem:[#allocation2 + $0x109] sm:$0xff] }
  0x5b   : > { %9407 = vst [vmem:[#allocation22_spill] sm:$0xff] %v8234_v50  ;;  %455 = vst.msk [vmem:[#allocation2 + $0x169] sm:$0xff] %vm284_vm1, %v8231_v49  ;;  %v8262_v7 = vpack.c.bf16 %v529_v2, %v528_v1  ;;  %v531_v10 = vld [vmem:[#allocation2 + $0x111] sm:$0xff]  ;;  %v8289_v2 = vpack.c.bf16 %v462_v63, %v461_v60  ;;  %v473_v63 = vld [vmem:[#allocation2 + $0xa8] sm:$0xff] }
  0x5c   : > { %456 = vst.msk [vmem:[#allocation2 + $0x171] sm:$0xff] %vm284_vm1, %v8234_v50  ;;  %v532_v29 = vld [vmem:[#allocation2 + $0x121] sm:$0xff]  ;;  %v8268_v31 = vpack.c.bf16 %v531_v10, %v530_v8  ;;  %v464_v1 = vld [vmem:[#allocation2 + $0x38] sm:$0xff]  ;;  %v1082_v10 = vsel %vm606_vm0, %v8198_v38, 0  ;;  %v471_v54 = vld [vmem:[#allocation2 + $0x90] sm:$0xff] }
  0x5d   : > { %v533_v30 = vld [vmem:[#allocation2 + $0x129] sm:$0xff]  ;;  %v8291_v8 = vpack.c.bf16 %v464_v1, %v463_v0  ;;  %v8316_v60 = vpack.c.bf16 %v472_v57, %v471_v54  ;;  %v475_v1 = vld [vmem:[#allocation2 + $0xc0] sm:$0xff] }
  0x5e   : > { %6630 = vmatmul.mubr.msk.bf16.gmra.mrb[8].mxu0 %vm284_vm1, %v8244_v55  ;;  %v8270_v33 = vpack.c.bf16 %v533_v30, %v532_v29  ;;  %v8298_v29 = vld [vmem:[%s9361_s1 + $0xc] sm:$0xf]  ;;  %v474_v0 = vld [vmem:[#allocation2 + $0xb0] sm:$0xff]  ;;  %v988_v47 = vld [vmem:[#allocation2 + $0x3a] sm:$0xff] }
  0x5f   : > { %6633 = vmatprep.mubr.msk.bf16.mxu0 %vm284_vm1, %v8246_v56  ;;  %v534_v34 = vld [vmem:[#allocation2 + $0x139] sm:$0xff]  ;;  %v535_v39 = vld [vmem:[#allocation2 + $0x141] sm:$0xff]  ;;  %v8351_v45 = vld [vmem:[%s8067_s10 + $0xf0] sm:$0xff]  ;;  %v1376_v27 = vsel %vm606_vm0, %v8298_v29, 0 }
  0x60   : > { %v536_v40 = vld [vmem:[#allocation2 + $0x151] sm:$0xff]  ;;  %v8276_v42 = vpack.c.bf16 %v535_v39, %v534_v34  ;;  %v465_v30 = vld [vmem:[#allocation2 + $0x48] sm:$0xff]  ;;  %v467_v39 = vld [vmem:[#allocation2 + $0x60] sm:$0xff]  ;;  %9408 = vst [vmem:[#allocation23_spill] sm:$0xff] %v8351_v45 }
  0x61   : > { %v537_v41 = vld [vmem:[#allocation2 + $0x159] sm:$0xff]  ;;  %v466_v34 = vld [vmem:[#allocation2 + $0x50] sm:$0xff]  ;;  %457 = vst.msk [vmem:[#allocation2 + $0x181] sm:$0xff] %vm284_vm1, %v8351_v45 }
  0x62   : > { %v8278_v51 = vpack.c.bf16 %v537_v41, %v536_v40  ;;  %v538_v52 = vld [vmem:[#allocation2 + $0x169] sm:$0xff]  ;;  %v8306_v38 = vpack.c.bf16 %v466_v34, %v465_v30  ;;  %v8322_v30 = vpack.c.bf16 %v474_v0, %v473_v63  ;;  %v987_v45 = vld [vmem:[#allocation2 + $0x32] sm:$0xff] }
  0x63   : > { %v539_v53 = vld [vmem:[#allocation2 + $0x171] sm:$0xff]  ;;  %v468_v40 = vld [vmem:[#allocation2 + $0x68] sm:$0xff]  ;;  %v8371_v36 = vpack.c.bf16 %v988_v47, %v987_v45 }
  0x64   : > { %v8284_v58 = vpack.c.bf16 %v539_v53, %v538_v52  ;;  %v8308_v41 = vpack.c.bf16 %v468_v40, %v467_v39  ;;  %v469_v52 = vld [vmem:[#allocation2 + $0x78] sm:$0xff]  ;;  %v470_v53 = vld [vmem:[#allocation2 + $0x80] sm:$0xff]  ;;  %v481_v63 = vld [vmem:[#allocation2 + $0x108] sm:$0xff] }
  0x65   : > { %v477_v39 = vld [vmem:[#allocation2 + $0xd8] sm:$0xff]  ;;  %v478_v40 = vld [vmem:[#allocation2 + $0xe0] sm:$0xff]  ;;  %v482_v0 = vld [vmem:[#allocation2 + $0x110] sm:$0xff] }
  0x66   : > { %6634 = vmatmul.mubr.msk.bf16.gmra.mrb[12].mxu0 %vm284_vm1, %v8252_v61  ;;  %v8330_v54 = vpack.c.bf16 %v478_v40, %v477_v39  ;;  %v8338_v50 = vpack.c.bf16 %v482_v0, %v481_v63  ;;  %v485_v39 = vld [vmem:[#allocation2 + $0x138] sm:$0xff]  ;;  %v486_v40 = vld [vmem:[#allocation2 + $0x140] sm:$0xff]  ;;  %v489_v0 = vld [vmem:[#allocation2 + $0x168] sm:$0xff] }
  0x67   : > { %6637 = vmatprep.mubr.msk.bf16.mxu0 %vm284_vm1, %v8254_v62  ;;  %v8346_v46 = vpack.c.bf16 %v486_v40, %v485_v39  ;;  %v8354_v63 = vld [vmem:[%s8067_s10 + $0xf8] sm:$0xff]  ;;  %v984_v39 = vld [vmem:[#allocation2 + $0xa] sm:$0xff] }
  0x68   : > { %9409 = vst [vmem:[#allocation24_spill] sm:$0xff] %v8354_v63  ;;  %458 = vst.msk [vmem:[#allocation2 + $0x189] sm:$0xff] %vm284_vm1, %v8354_v63  ;;  %v986_v63 = vld [vmem:[#allocation2 + $0x22] sm:$0xff] }
  0x6e   : > { %6638 = vmatmul.mubr.msk.bf16.gmra.mrb[16].mxu0 %vm284_vm1, %v8260_v3 }
  0x6f   : > { %6641 = vmatprep.mubr.msk.bf16.mxu0 %vm284_vm1, %v8262_v7 }
  0x76   : > { %6642 = vmatmul.mubr.msk.bf16.gmra.mrb[20].mxu0 %vm284_vm1, %v8268_v31 }
  0x77   : > { %6645 = vmatprep.mubr.msk.bf16.mxu0 %vm284_vm1, %v8270_v33 }
  0x7e   : > { %6646 = vmatmul.mubr.msk.bf16.gmra.mrb[24].mxu0 %vm284_vm1, %v8276_v42 }
  0x7f   : > { %6649 = vmatprep.mubr.msk.bf16.mxu0 %vm284_vm1, %v8278_v51 }
  0x86   : > { %6650 = vmatmul.mubr.msk.bf16.gmra.mrb[28].mxu0 %vm284_vm1, %v8284_v58 }
  0x87   : > { %6655 = vmatprep.mubr.msk.bf16.mxu0 %vm284_vm1, %v491_v59  ;;  %v8314_v59 = vpack.c.bf16 %v470_v53, %v469_v52  ;;  %v479_v52 = vld [vmem:[#allocation2 + $0xf0] sm:$0xff]  ;;  %v480_v53 = vld [vmem:[#allocation2 + $0xf8] sm:$0xff] }
  0x88   : > { %v8332_v57 = vpack.c.bf16 %v480_v53, %v479_v52  ;;  %v487_v52 = vld [vmem:[#allocation2 + $0x150] sm:$0xff]  ;;  %v488_v53 = vld [vmem:[#allocation2 + $0x158] sm:$0xff] }
  0x89   : > { %v8348_v48 = vpack.c.bf16 %v488_v53, %v487_v52  ;;  %v985_v53 = vld [vmem:[#allocation2 + $0x1a] sm:$0xff] }
  0x8a   : > { %v8369_v28 = vpack.c.bf16 %v986_v63, %v985_v53  ;;  %v991_v63 = vld [vmem:[#allocation2 + $0x62] sm:$0xff]  ;;  %v996_v53 = vld [vmem:[#allocation2 + $0x9a] sm:$0xff] }
  0x8e   : > { %6656 = vmatmul.mubr.msk.bf16.vlgmr.msra.gmra.mrb[0].mxu0 %vm284_vm1, %v8289_v2 }
  0x8f   : > { %6688 = vmatpush3.bf16.msra.mxu0 %v1082_v10  ;;  %6659 = vmatprep.mubr.msk.bf16.mxu0 %vm284_vm1, %v8291_v8  ;;  %v476_v10 = vld [vmem:[#allocation2 + $0xc8] sm:$0xff] }
  0x90   : > { %7746 = vmatprep.subr.msk.bf16.mxu0 %vm606_vm0, %v8298_v29  ;;  %v8324_v34 = vpack.c.bf16 %v476_v10, %v475_v1  ;;  %v483_v1 = vld [vmem:[#allocation2 + $0x120] sm:$0xff]  ;;  %v484_v10 = vld [vmem:[#allocation2 + $0x128] sm:$0xff] }
  0x91   : > { %v8340_v49 = vpack.c.bf16 %v484_v10, %v483_v1  ;;  %v490_v1 = vld [vmem:[#allocation2 + $0x170] sm:$0xff]  ;;  %v983_v10 = vld [vmem:[#allocation2 + $0x2] sm:$0xff] }
  0x92   : > { %v8364_v40 = vpack.c.bf16 %v490_v1, %v489_v0  ;;  %v1015_v52 = vpack.c.bf16 %v984_v39, %v983_v10  ;;  %v6068_v0 = vld [vmem:[%s9361_s1 + $0x10] sm:$0xf]  ;;  %v994_v29 = vld [vmem:[#allocation2 + $0x82] sm:$0xff] }
  0x93   : > { %v989_v1 = vld [vmem:[#allocation2 + $0x4a] sm:$0xff]  ;;  %v990_v10 = vld [vmem:[#allocation2 + $0x52] sm:$0xff] }
  0x94   : > { %v992_v39 = vld [vmem:[#allocation2 + $0x6a] sm:$0xff]  ;;  %v8383_v45 = vpack.c.bf16 %v990_v10, %v989_v1  ;;  %v998_v10 = vld [vmem:[#allocation2 + $0xb2] sm:$0xff] }
  0x95   : > { %v8385_v47 = vpack.c.bf16 %v992_v39, %v991_v63  ;;  %v997_v1 = vld [vmem:[#allocation2 + $0xaa] sm:$0xff]  ;;  %v999_v63 = vld [vmem:[#allocation2 + $0xc2] sm:$0xff] }
  0x96   : > { %6660 = vmatmul.mubr.msk.bf16.gmra.mrb[4].mxu0 %vm284_vm1, %v8306_v38  ;;  %v1000_v39 = vld [vmem:[#allocation2 + $0xca] sm:$0xff]  ;;  %v8399_v26 = vpack.c.bf16 %v998_v10, %v997_v1  ;;  %v1006_v10 = vld [vmem:[#allocation2 + $0x112] sm:$0xff] }
  0x97   : > { %6663 = vmatprep.mubr.msk.bf16.mxu0 %vm284_vm1, %v8308_v41  ;;  %v8401_v23 = vpack.c.bf16 %v1000_v39, %v999_v63  ;;  %v1005_v1 = vld [vmem:[#allocation2 + $0x10a] sm:$0xff]  ;;  %v1007_v63 = vld [vmem:[#allocation2 + $0x122] sm:$0xff] }
  0x98   : > { %v1008_v39 = vld [vmem:[#allocation2 + $0x12a] sm:$0xff]  ;;  %v8415_v22 = vpack.c.bf16 %v1006_v10, %v1005_v1  ;;  %v1014_v10 = vld [vmem:[#allocation2 + $0x172] sm:$0xff] }
  0x99   : > { %v8417_v19 = vpack.c.bf16 %v1008_v39, %v1007_v63  ;;  %v1013_v1 = vld [vmem:[#allocation2 + $0x16a] sm:$0xff]  ;;  %v1670_v39 = vsel %vm606_vm0, %v6068_v0, 0 }
  0x9a   : > { %v8431_v63 = vpack.c.bf16 %v1014_v10, %v1013_v1  ;;  %v6119_v1 = vld [vmem:[%s9361_s1 + $0x1c] sm:$0xf]  ;;  %v1896_v10 = vld [vmem:[#allocation2 + $0x18a] sm:$0xff] }
  0x9e   : > { %6664 = vmatmul.mubr.msk.bf16.gmra.mrb[8].mxu0 %vm284_vm1, %v8314_v59 }
  0x9f   : > { %6667 = vmatprep.mubr.msk.bf16.mxu0 %vm284_vm1, %v8316_v60 }
  0xa6   : > { %6668 = vmatmul.mubr.msk.bf16.gmra.mrb[12].mxu0 %vm284_vm1, %v8322_v30 }
  0xa7   : > { %6671 = vmatprep.mubr.msk.bf16.mxu0 %vm284_vm1, %v8324_v34 }
  0xae   : > { %6672 = vmatmul.mubr.msk.bf16.gmra.mrb[16].mxu0 %vm284_vm1, %v8330_v54 }
  0xaf   : > { %6675 = vmatprep.mubr.msk.bf16.mxu0 %vm284_vm1, %v8332_v57 }
  0xb6   : > { %6676 = vmatmul.mubr.msk.bf16.gmra.mrb[20].mxu0 %vm284_vm1, %v8338_v50 }
  0xb7   : > { %6679 = vmatprep.mubr.msk.bf16.mxu0 %vm284_vm1, %v8340_v49 }
  0xbe   : > { %6680 = vmatmul.mubr.msk.bf16.gmra.mrb[24].mxu0 %vm284_vm1, %v8346_v46 }
  0xbf   : > { %6683 = vmatprep.mubr.msk.bf16.mxu0 %vm284_vm1, %v8348_v48 }
  0xc6   : > { %6684 = vmatmul.mubr.msk.bf16.gmra.mrb[28].mxu0 %vm284_vm1, %v8364_v40 }
  0xc7   : > { %6689 = vmatprep.mubr.msk.bf16.mxu0 %vm284_vm1, %v1015_v52  ;;  %v995_v52 = vld [vmem:[#allocation2 + $0x92] sm:$0xff] }
  0xc8   : > { %v8393_v24 = vpack.c.bf16 %v996_v53, %v995_v52  ;;  %v1003_v52 = vld [vmem:[#allocation2 + $0xf2] sm:$0xff]  ;;  %v1004_v53 = vld [vmem:[#allocation2 + $0xfa] sm:$0xff] }
  0xc9   : > { %v8409_v20 = vpack.c.bf16 %v1004_v53, %v1003_v52  ;;  %v1011_v52 = vld [vmem:[#allocation2 + $0x152] sm:$0xff]  ;;  %v1012_v53 = vld [vmem:[#allocation2 + $0x15a] sm:$0xff] }
  0xca   : > { %v8425_v16 = vpack.c.bf16 %v1012_v53, %v1011_v52  ;;  %v6102_v53 = vld [vmem:[%s9361_s1 + $0x18] sm:$0xf] }
  0xce   : > { %6690 = vmatmul.mubr.msk.bf16.vlgmr.msra.gmra.mrb[0].mxu0 %vm284_vm1, %v8369_v28 }
  0xcf   : > { %6722 = vmatpush3.bf16.msra.mxu0 %v1376_v27  ;;  %6693 = vmatprep.mubr.msk.bf16.mxu0 %vm284_vm1, %v8371_v36  ;;  %v993_v27 = vld [vmem:[#allocation2 + $0x7a] sm:$0xff] }
  0xd0   : > { %7747 = vmatprep.subr.msk.bf16.mxu0 %vm606_vm0, %v6068_v0  ;;  %v8391_v35 = vpack.c.bf16 %v994_v29, %v993_v27  ;;  %v1001_v27 = vld [vmem:[#allocation2 + $0xda] sm:$0xff]  ;;  %v1002_v29 = vld [vmem:[#allocation2 + $0xe2] sm:$0xff] }
  0xd1   : > { %v8407_v25 = vpack.c.bf16 %v1002_v29, %v1001_v27  ;;  %v1009_v27 = vld [vmem:[#allocation2 + $0x13a] sm:$0xff]  ;;  %v1010_v29 = vld [vmem:[#allocation2 + $0x142] sm:$0xff] }
  0xd2   : > { %v8423_v21 = vpack.c.bf16 %v1010_v29, %v1009_v27  ;;  %v6085_v27 = vld [vmem:[%s9361_s1 + $0x14] sm:$0xf]  ;;  %v1308_v0 = vld [vmem:[#allocation2 + $0x188] sm:$0xff] }
  0xd3   : > { %v1964_v52 = vsel %vm606_vm0, %v6085_v27, 0 }
  0xd6   : > { %6694 = vmatmul.mubr.msk.bf16.gmra.mrb[4].mxu0 %vm284_vm1, %v8383_v45 }
  0xd7   : > { %6697 = vmatprep.mubr.msk.bf16.mxu0 %vm284_vm1, %v8385_v47 }
  0xde   : > { %6698 = vmatmul.mubr.msk.bf16.gmra.mrb[8].mxu0 %vm284_vm1, %v8391_v35 }
  0xdf   : > { %6701 = vmatprep.mubr.msk.bf16.mxu0 %vm284_vm1, %v8393_v24 }
  0xe6   : > { %6702 = vmatmul.mubr.msk.bf16.gmra.mrb[12].mxu0 %vm284_vm1, %v8399_v26 }
  0xe7   : > { %6705 = vmatprep.mubr.msk.bf16.mxu0 %vm284_vm1, %v8401_v23 }
  0xee   : > { %6706 = vmatmul.mubr.msk.bf16.gmra.mrb[16].mxu0 %vm284_vm1, %v8407_v25 }
  0xef   : > { %6709 = vmatprep.mubr.msk.bf16.mxu0 %vm284_vm1, %v8409_v20 }
  0xf6   : > { %6710 = vmatmul.mubr.msk.bf16.gmra.mrb[20].mxu0 %vm284_vm1, %v8415_v22 }
  0xf7   : > { %6713 = vmatprep.mubr.msk.bf16.mxu0 %vm284_vm1, %v8417_v19 }
  0xfe   : > { %6714 = vmatmul.mubr.msk.bf16.gmra.mrb[24].mxu0 %vm284_vm1, %v8423_v21 }
  0xff   : > { %6717 = vmatprep.mubr.msk.bf16.mxu0 %vm284_vm1, %v8425_v16 }
 0x106   : > { %6718 = vmatmul.mubr.msk.bf16.gmra.mrb[28].mxu0 %vm284_vm1, %v8431_v63 }
 0x107   : > { %6723 = vmatprep.mubr.msk.bf16.mxu0 %vm284_vm1, %v8289_v2  ;;  %v1307_v2 = vld [vmem:[#allocation2 + $0x180] sm:$0xff] }
 0x108   : > { %v8470_v29 = vpack.c.bf16 %v1308_v0, %v1307_v2  ;;  %v6136_v2 = vld [vmem:[%s9361_s1 + $0x20] sm:$0xf] }
 0x10e   : > { %6724 = vmatmul.mubr.msk.bf16.vlgmr.msra.gmra.mrb[0].mxu0 %vm284_vm1, %v8291_v8 }
 0x10f   : > { %6756 = vmatpush3.bf16.msra.mxu0 %v1670_v39  ;;  %6727 = vmatprep.mubr.msk.bf16.mxu0 %vm284_vm1, %v8306_v38 }
 0x110   : > { %7748 = vmatprep.subr.msk.bf16.mxu0 %vm606_vm0, %v6085_v27  ;;  %v2553_v27 = vsel %vm606_vm0, %v6119_v1, 0 }
 0x116   : > { %6728 = vmatmul.mubr.msk.bf16.gmra.mrb[4].mxu0 %vm284_vm1, %v8308_v41 }
 0x117   : > { %6731 = vmatprep.mubr.msk.bf16.mxu0 %vm284_vm1, %v8314_v59 }
 0x11e   : > { %6732 = vmatmul.mubr.msk.bf16.gmra.mrb[8].mxu0 %vm284_vm1, %v8316_v60 }
 0x11f   : > { %6735 = vmatprep.mubr.msk.bf16.mxu0 %vm284_vm1, %v8322_v30 }
 0x126   : > { %6736 = vmatmul.mubr.msk.bf16.gmra.mrb[12].mxu0 %vm284_vm1, %v8324_v34 }
 0x127   : > { %6739 = vmatprep.mubr.msk.bf16.mxu0 %vm284_vm1, %v8330_v54 }
 0x12e   : > { %6740 = vmatmul.mubr.msk.bf16.gmra.mrb[16].mxu0 %vm284_vm1, %v8332_v57 }
 0x12f   : > { %6743 = vmatprep.mubr.msk.bf16.mxu0 %vm284_vm1, %v8338_v50 }
 0x136   : > { %6744 = vmatmul.mubr.msk.bf16.gmra.mrb[20].mxu0 %vm284_vm1, %v8340_v49 }
 0x137   : > { %6747 = vmatprep.mubr.msk.bf16.mxu0 %vm284_vm1, %v8346_v46 }
 0x13e   : > { %6748 = vmatmul.mubr.msk.bf16.gmra.mrb[24].mxu0 %vm284_vm1, %v8348_v48 }
 0x13f   : > { %6751 = vmatprep.mubr.msk.bf16.mxu0 %vm284_vm1, %v8364_v40 }
 0x146   : > { %6752 = vmatmul.mubr.msk.bf16.gmra.mrb[28].mxu0 %vm284_vm1, %v8470_v29 }
 0x147   : > { %6757 = vmatprep.mubr.msk.bf16.mxu0 %vm284_vm1, %v8180_v32  ;;  %v1601_v32 = vld [vmem:[#allocation2 + $0x181] sm:$0xff] }
 0x14e   : > { %6758 = vmatmul.mubr.msk.bf16.vlgmr.msra.gmra.mrb[0].mxu0 %vm284_vm1, %v8189_v37  ;;  %v1602_v37 = vld [vmem:[#allocation2 + $0x189] sm:$0xff] }
 0x14f   : > { %6790 = vmatpush3.bf16.msra.mxu0 %v1964_v52  ;;  %6761 = vmatprep.mubr.msk.bf16.mxu0 %vm284_vm1, %v8206_v43  ;;  %v8509_v43 = vpack.c.bf16 %v1602_v37, %v1601_v32 }
 0x150   : > { %7749 = vmatprep.subr.msk.bf16.mxu0 %vm606_vm0, %v6102_v53 }
 0x156   : > { %6762 = vmatmul.mubr.msk.bf16.gmra.mrb[4].mxu0 %vm284_vm1, %v8208_v44  ;;  %v2259_v44 = vsel %vm606_vm0, %v6102_v53, 0 }
 0x157   : > { %6765 = vmatprep.mubr.msk.bf16.mxu0 %vm284_vm1, %v8244_v55 }
 0x15e   : > { %6766 = vmatmul.mubr.msk.bf16.gmra.mrb[8].mxu0 %vm284_vm1, %v8246_v56 }
 0x15f   : > { %6769 = vmatprep.mubr.msk.bf16.mxu0 %vm284_vm1, %v8252_v61 }
 0x166   : > { %6770 = vmatmul.mubr.msk.bf16.gmra.mrb[12].mxu0 %vm284_vm1, %v8254_v62 }
 0x167   : > { %6773 = vmatprep.mubr.msk.bf16.mxu0 %vm284_vm1, %v8260_v3 }
 0x16e   : > { %6774 = vmatmul.mubr.msk.bf16.gmra.mrb[16].mxu0 %vm284_vm1, %v8262_v7 }
 0x16f   : > { %6777 = vmatprep.mubr.msk.bf16.mxu0 %vm284_vm1, %v8268_v31 }
 0x176   : > { %6778 = vmatmul.mubr.msk.bf16.gmra.mrb[20].mxu0 %vm284_vm1, %v8270_v33 }
 0x177   : > { %6781 = vmatprep.mubr.msk.bf16.mxu0 %vm284_vm1, %v8276_v42 }
 0x17e   : > { %6782 = vmatmul.mubr.msk.bf16.gmra.mrb[24].mxu0 %vm284_vm1, %v8278_v51 }
 0x17f   : > { %6785 = vmatprep.mubr.msk.bf16.mxu0 %vm284_vm1, %v8284_v58 }
 0x186   : > { %6786 = vmatmul.mubr.msk.bf16.gmra.mrb[28].mxu0 %vm284_vm1, %v8509_v43 }
 0x187   : > { %6791 = vmatprep.mubr.msk.bf16.mxu0 %vm284_vm1, %v8369_v28  ;;  %v1895_v28 = vld [vmem:[#allocation2 + $0x182] sm:$0xff] }
 0x188   : > { %v8548_v39 = vpack.c.bf16 %v1896_v10, %v1895_v28 }
 0x18e   : > { %6792 = vmatmul.mubr.msk.bf16.vlgmr.msra.gmra.mrb[0].mxu0 %vm284_vm1, %v8371_v36 }
 0x18f   : > { %6824 = vmatpush3.bf16.msra.mxu0 %v2259_v44  ;;  %6795 = vmatprep.mubr.msk.bf16.mxu0 %vm284_vm1, %v8383_v45 }
 0x190   : > { %7750 = vmatprep.subr.msk.bf16.mxu0 %vm606_vm0, %v6119_v1 }
 0x196   : > { %6796 = vmatmul.mubr.msk.bf16.gmra.mrb[4].mxu0 %vm284_vm1, %v8385_v47 }
 0x197   : > { %6799 = vmatprep.mubr.msk.bf16.mxu0 %vm284_vm1, %v8391_v35 }
 0x19e   : > { %6800 = vmatmul.mubr.msk.bf16.gmra.mrb[8].mxu0 %vm284_vm1, %v8393_v24 }
 0x19f   : > { %6803 = vmatprep.mubr.msk.bf16.mxu0 %vm284_vm1, %v8399_v26 }
 0x1a6   : > { %6804 = vmatmul.mubr.msk.bf16.gmra.mrb[12].mxu0 %vm284_vm1, %v8401_v23 }
 0x1a7   : > { %6807 = vmatprep.mubr.msk.bf16.mxu0 %vm284_vm1, %v8407_v25 }
 0x1ae   : > { %6808 = vmatmul.mubr.msk.bf16.gmra.mrb[16].mxu0 %vm284_vm1, %v8409_v20 }
 0x1af   : > { %6811 = vmatprep.mubr.msk.bf16.mxu0 %vm284_vm1, %v8415_v22 }
 0x1b6   : > { %6812 = vmatmul.mubr.msk.bf16.gmra.mrb[20].mxu0 %vm284_vm1, %v8417_v19 }
 0x1b7   : > { %6815 = vmatprep.mubr.msk.bf16.mxu0 %vm284_vm1, %v8423_v21 }
 0x1be   : > { %6816 = vmatmul.mubr.msk.bf16.gmra.mrb[24].mxu0 %vm284_vm1, %v8425_v16 }
 0x1bf   : > { %6819 = vmatprep.mubr.msk.bf16.mxu0 %vm284_vm1, %v8431_v63 }
 0x1c6   : > { %6820 = vmatmul.mubr.msk.bf16.gmra.mrb[28].mxu0 %vm284_vm1, %v8548_v39 }
 0x1c7   : > { %6825 = vmatprep.mubr.msk.bf16.mxu0 %vm284_vm1, %v8291_v8  ;;  %v2190_v8 = vld [vmem:[#allocation2 + $0x198] sm:$0xff] }
 0x1ce   : > { %6826 = vmatmul.mubr.msk.bf16.vlgmr.msra.gmra.mrb[0].mxu0 %vm284_vm1, %v8306_v38  ;;  %v2191_v38 = vld [vmem:[#allocation2 + $0x1a0] sm:$0xff] }
 0x1cf   : > { %6858 = vmatpush3.bf16.msra.mxu0 %v2553_v27  ;;  %6829 = vmatprep.mubr.msk.bf16.mxu0 %vm284_vm1, %v8308_v41  ;;  %v2454_v41 = vld [vmem:[#allocation2 + $0x31] sm:$0xff] }
 0x1d0   : > { %7751 = vmatprep.subr.msk.bf16.mxu0 %vm606_vm0, %v6136_v2 }
 0x1d6   : > { %6830 = vmatmul.mubr.msk.bf16.gmra.mrb[4].mxu0 %vm284_vm1, %v8314_v59  ;;  %v2455_v59 = vld [vmem:[#allocation2 + $0x39] sm:$0xff] }
 0x1d7   : > { %6833 = vmatprep.mubr.msk.bf16.mxu0 %vm284_vm1, %v8316_v60  ;;  %v2486_v60 = vpack.c.bf16 %v2455_v59, %v2454_v41 }
 0x1de   : > { %6834 = vmatmul.mubr.msk.bf16.gmra.mrb[8].mxu0 %vm284_vm1, %v8322_v30  ;;  %v2458_v30 = vld [vmem:[#allocation2 + $0x61] sm:$0xff] }
 0x1df   : > { %6837 = vmatprep.mubr.msk.bf16.mxu0 %vm284_vm1, %v8324_v34 }
 0x1e6   : > { %6838 = vmatmul.mubr.msk.bf16.gmra.mrb[12].mxu0 %vm284_vm1, %v8330_v54 }
 0x1e7   : > { %6841 = vmatprep.mubr.msk.bf16.mxu0 %vm284_vm1, %v8332_v57  ;;  %v2847_v57 = vsel %vm606_vm0, %v6136_v2, 0 }
 0x1ee   : > { %6842 = vmatmul.mubr.msk.bf16.gmra.mrb[16].mxu0 %vm284_vm1, %v8338_v50  ;;  %v2207_v50 = vpack.c.bf16 %v2191_v38, %v2190_v8 }
 0x1ef   : > { %6845 = vmatprep.mubr.msk.bf16.mxu0 %vm284_vm1, %v8340_v49  ;;  %v2457_v49 = vld [vmem:[#allocation2 + $0x51] sm:$0xff] }
 0x1f6   : > { %6846 = vmatmul.mubr.msk.bf16.gmra.mrb[20].mxu0 %vm284_vm1, %v8346_v46  ;;  %v2456_v46 = vld [vmem:[#allocation2 + $0x49] sm:$0xff] }
 0x1f7   : > { %6849 = vmatprep.mubr.msk.bf16.mxu0 %vm284_vm1, %v8348_v48  ;;  %v2459_v48 = vld [vmem:[#allocation2 + $0x69] sm:$0xff]  ;;  %v2487_v34 = vpack.c.bf16 %v2457_v49, %v2456_v46 }
 0x1f8   : > { %v2488_v54 = vpack.c.bf16 %v2459_v48, %v2458_v30 }
 0x1fe   : > { %6850 = vmatmul.mubr.msk.bf16.gmra.mrb[24].mxu0 %vm284_vm1, %v8364_v40 }
 0x1ff   : > { %6853 = vmatprep.mubr.msk.bf16.mxu0 %vm284_vm1, %v8470_v29 }
 0x206   : > { %6854 = vmatmul.mubr.msk.bf16.gmra.mrb[28].mxu0 %vm284_vm1, %v2207_v50 }
 0x207   : > { %6859 = vmatprep.mubr.msk.bf16.mxu0 %vm284_vm1, %v2486_v60 }
 0x20e   : > { %6860 = vmatmul.mubr.msk.bf16.vlgmr.msra.gmra.mrb[0].mxu0 %vm284_vm1, %v2487_v34 }
 0x20f   : > { %6892 = vmatpush3.bf16.msra.mxu0 %v2847_v57  ;;  %6863 = vmatprep.mubr.msk.bf16.mxu0 %vm284_vm1, %v2488_v54 }
 0x216   : > { %6864 = vmatmul.mubr.msk.bf16.gmra.mrb[4].mxu0 %vm284_vm1, %v8244_v55  ;;  %v2484_v55 = vld [vmem:[#allocation2 + $0x199] sm:$0xff] }
 0x217   : > { %6867 = vmatprep.mubr.msk.bf16.mxu0 %vm284_vm1, %v8246_v56  ;;  %v2485_v56 = vld [vmem:[#allocation2 + $0x1a1] sm:$0xff] }
 0x21e   : > { %6868 = vmatmul.mubr.msk.bf16.gmra.mrb[8].mxu0 %vm284_vm1, %v8252_v61  ;;  %v2501_v61 = vpack.c.bf16 %v2485_v56, %v2484_v55 }
 0x21f   : > { %6871 = vmatprep.mubr.msk.bf16.mxu0 %vm284_vm1, %v8254_v62 }
 0x226   : > { %6872 = vmatmul.mubr.msk.bf16.gmra.mrb[12].mxu0 %vm284_vm1, %v8260_v3 }
 0x227   : > { %6875 = vmatprep.mubr.msk.bf16.mxu0 %vm284_vm1, %v8262_v7 }
 0x22e   : > { %6876 = vmatmul.mubr.msk.bf16.gmra.mrb[16].mxu0 %vm284_vm1, %v8268_v31 }
 0x22f   : > { %6879 = vmatprep.mubr.msk.bf16.mxu0 %vm284_vm1, %v8270_v33 }
 0x236   : > { %6880 = vmatmul.mubr.msk.bf16.gmra.mrb[20].mxu0 %vm284_vm1, %v8276_v42 }
 0x237   : > { %6883 = vmatprep.mubr.msk.bf16.mxu0 %vm284_vm1, %v8278_v51 }
 0x23e   : > { %6884 = vmatmul.mubr.msk.bf16.gmra.mrb[24].mxu0 %vm284_vm1, %v8284_v58 }
 0x23f   : > { %6887 = vmatprep.mubr.msk.bf16.mxu0 %vm284_vm1, %v8509_v43 }
 0x246   : > { %6888 = vmatmul.mubr.msk.bf16.gmra.mrb[28].mxu0 %vm284_vm1, %v2501_v61 }
 0x247   : > { %6893 = vmatprep.mubr.msk.bf16.mxu0 %vm284_vm1, %v8371_v36  ;;  %v8666_v36 = vld [vmem:[%s9363_s3] ss:$0 sm:$0xff] }
 0x24e   : > { %6894 = vmatmul.mubr.msk.bf16.vlgmr.msra.gmra.mrb[0].mxu0 %vm284_vm1, %v8383_v45 }
 0x24f   : > { %6897 = vmatprep.mubr.msk.bf16.mxu0 %vm284_vm1, %v8385_v47 }
 0x256   : > { %6898 = vmatmul.mubr.msk.bf16.gmra.mrb[4].mxu0 %vm284_vm1, %v8391_v35  ;;  %v8661_v35 = vld [vmem:[%s9362_s2] ss:$0 sm:$0xff] }
 0x257   : > { %6901 = vmatprep.mubr.msk.bf16.mxu0 %vm284_vm1, %v8393_v24 }
 0x25e   : > { %6902 = vmatmul.mubr.msk.bf16.gmra.mrb[8].mxu0 %vm284_vm1, %v8399_v26  ;;  %v3231_v26 = vld [vmem:[%s9364_s4] sm:$0xf] }
 0x25f   : > { %6905 = vmatprep.mubr.msk.bf16.mxu0 %vm284_vm1, %v8401_v23  ;;  %v2778_v23 = vld [vmem:[#allocation2 + $0x19a] sm:$0xff]  ;;  %v3543_v61 = vsel %vm606_vm0, %v3231_v26, 0 }
 0x266   : > { %6906 = vmatmul.mubr.msk.bf16.gmra.mrb[12].mxu0 %vm284_vm1, %v8407_v25 }
 0x267   : > { %6909 = vmatprep.mubr.msk.bf16.mxu0 %vm284_vm1, %v8409_v20  ;;  %v2779_v20 = vld [vmem:[#allocation2 + $0x1a2] sm:$0xff] }
 0x268   : > { %v2795_v24 = vpack.c.bf16 %v2779_v20, %v2778_v23 }
 0x26e   : > { %6910 = vmatmul.mubr.msk.bf16.gmra.mrb[16].mxu0 %vm284_vm1, %v8415_v22  ;;  %v3233_v22 = vld [vmem:[#allocation3 + $0x9] sm:$0xff] }
 0x26f   : > { %6913 = vmatprep.mubr.msk.bf16.mxu0 %vm284_vm1, %v8417_v19  ;;  %v6155_v19 = vld [vmem:[%s9364_s4 + $0x4] sm:$0xf] }
 0x270   : > { %7752 = vmatprep.subr.msk.bf16.mxu1 %vm606_vm0, %v6155_v19 }
 0x276   : > { %6914 = vmatmul.mubr.msk.bf16.gmra.mrb[20].mxu0 %vm284_vm1, %v8423_v21  ;;  %v3331_v21 = vsel %vm606_vm0, %v6155_v19, 0 }
 0x277   : > { %6917 = vmatprep.mubr.msk.bf16.mxu0 %vm284_vm1, %v8425_v16  ;;  %v3232_v16 = vld [vmem:[#allocation3 + $0x1] sm:$0xff]  ;;  %6926 = vmatpush3.bf16.msra.mxu1 %v3331_v21 }
 0x278   : > { %v3264_v25 = vpack.c.bf16 %v3233_v22, %v3232_v16  ;;  %7753 = vmatprep.subr.msk.bf16.mxu1 %vm606_vm0, %v3231_v26  ;;  %v8704_v16 = vld [vmem:[%s9364_s4 + $0x8] sm:$0xf] }
 0x27a   : > { %6927 = vmatprep.mubr.msk.bf16.mxu1 %vm284_vm1, %v3264_v25 }
 0x27e   : > { %6918 = vmatmul.mubr.msk.bf16.gmra.mrb[24].mxu0 %vm284_vm1, %v8431_v63 }
 0x27f   : > { %6921 = vmatprep.mubr.msk.bf16.mxu0 %vm284_vm1, %v8548_v39 }
 0x286   : > { %6922 = vmatmul.mubr.msk.bf16.gmra.mrb[28].mxu0 %vm284_vm1, %v2795_v24 }
 0x321   : > { %v6895_v62 = vpop.f32.mrb[0].mxu0 }
 0x322   : > { %v3050_v3 = vmul.f32 %v6895_v62, %v8661_v35  ;;  %v2883_v7 = vpop.f32.mrb[1].mxu0 }
 0x323   : > { %v3048_v31 = vmul.f32 %v8661_v35, %v2883_v7  ;;  %v6896_v33 = vpop.f32.mrb[2].mxu0 }
 0x324   : > { %v3088_v42 = vadd.f32 %v8666_v36, %v3050_v3  ;;  %v3051_v51 = vmul.f32 %v6896_v33, %v8661_v35  ;;  %v2886_v58 = vpop.f32.mrb[3].mxu0 }
 0x325   : > { %v3086_v40 = vadd.f32 %v8666_v36, %v3048_v31  ;;  %v3049_v45 = vmul.f32 %v8661_v35, %v2886_v58 }
 0x326   : > { %v3120_v47 = vmax.f32 %v3088_v42, 0.0  ;;  %v3089_v63 = vadd.f32 %v8666_v36, %v3051_v51 }
 0x327   : > { %v3118_v0 = vmax.f32 %v3086_v40, 0.0  ;;  %v3087_v29 = vadd.f32 %v8666_v36, %v3049_v45 }
 0x328   : > { %3153 = vst.msk [vmem:[#allocation3 + $0x31] sm:$0xff] %vm284_vm1, %v3120_v47  ;;  %v3121_v52 = vmax.f32 %v3089_v63, 0.0 }
 0x329   : > { %3151 = vst.msk [vmem:[#allocation3 + $0x19] sm:$0xff] %vm284_vm1, %v3118_v0  ;;  %v3119_v53 = vmax.f32 %v3087_v29, 0.0  ;;  %v6899_v32 = vpop.f32.mrb[4].mxu0 }
 0x32a   : > { %3154 = vst.msk [vmem:[#allocation3 + $0x39] sm:$0xff] %vm284_vm1, %v3121_v52  ;;  %v3054_v37 = vmul.f32 %v6899_v32, %v8661_v35  ;;  %v2899_v43 = vpop.f32.mrb[5].mxu0 }
 0x32b   : > { %3152 = vst.msk [vmem:[#allocation3 + $0x21] sm:$0xff] %vm284_vm1, %v3119_v53  ;;  %v3052_v44 = vmul.f32 %v8661_v35, %v2899_v43  ;;  %v6900_v1 = vpop.f32.mrb[6].mxu0 }
 0x32c   : > { %v3092_v28 = vadd.f32 %v8666_v36, %v3054_v37  ;;  %v3055_v10 = vmul.f32 %v6900_v1, %v8661_v35  ;;  %v2902_v39 = vpop.f32.mrb[7].mxu0 }
 0x32d   : > { %v3090_v27 = vadd.f32 %v8666_v36, %v3052_v44  ;;  %v3053_v2 = vmul.f32 %v8661_v35, %v2902_v39 }
 0x32e   : > { %v3124_v8 = vmax.f32 %v3092_v28, 0.0  ;;  %v3093_v38 = vadd.f32 %v8666_v36, %v3055_v10 }
 0x32f   : > { %v3122_v41 = vmax.f32 %v3090_v27, 0.0  ;;  %v3091_v59 = vadd.f32 %v8666_v36, %v3053_v2  ;;  %v3236_v23 = vld [vmem:[#allocation3 + $0x31] sm:$0xff] }
 0x330   : > { %3157 = vst.msk [vmem:[#allocation3 + $0x61] sm:$0xff] %vm284_vm1, %v3124_v8  ;;  %v3125_v50 = vmax.f32 %v3093_v38, 0.0  ;;  %v3234_v34 = vld [vmem:[#allocation3 + $0x19] sm:$0xff] }
 0x331   : > { %3155 = vst.msk [vmem:[#allocation3 + $0x49] sm:$0xff] %vm284_vm1, %v3122_v41  ;;  %v3123_v60 = vmax.f32 %v3091_v59, 0.0  ;;  %v6903_v46 = vpop.f32.mrb[8].mxu0  ;;  %v3237_v49 = vld [vmem:[#allocation3 + $0x39] sm:$0xff] }
 0x332   : > { %3158 = vst.msk [vmem:[#allocation3 + $0x69] sm:$0xff] %vm284_vm1, %v3125_v50  ;;  %v3058_v30 = vmul.f32 %v6903_v46, %v8661_v35  ;;  %v2915_v48 = vpop.f32.mrb[9].mxu0  ;;  %v3235_v54 = vld [vmem:[#allocation3 + $0x21] sm:$0xff]  ;;  %v8699_v21 = vpack.c.bf16 %v3237_v49, %v3236_v23 }
 0x333   : > { %3156 = vst.msk [vmem:[#allocation3 + $0x51] sm:$0xff] %vm284_vm1, %v3123_v60  ;;  %v3056_v57 = vmul.f32 %v8661_v35, %v2915_v48  ;;  %v6904_v55 = vpop.f32.mrb[10].mxu0  ;;  %v8694_v56 = vpack.c.bf16 %v3235_v54, %v3234_v34 }
 0x334   : > { %v3096_v20 = vadd.f32 %v8666_v36, %v3058_v30  ;;  %v3059_v24 = vmul.f32 %v6904_v55, %v8661_v35  ;;  %v2918_v19 = vpop.f32.mrb[11].mxu0 }
 0x335   : > { %v3094_v22 = vadd.f32 %v8666_v36, %v3056_v57  ;;  %v3057_v25 = vmul.f32 %v8661_v35, %v2918_v19  ;;  %6928 = vmatmul.mubr.msk.bf16.vlgmr.msra.gmra.mrb[0].mxu1 %vm284_vm1, %v8694_v56 }
 0x336   : > { %v3128_v26 = vmax.f32 %v3096_v20, 0.0  ;;  %v3097_v62 = vadd.f32 %v8666_v36, %v3059_v24  ;;  %6960 = vmatpush3.bf16.msra.mxu1 %v3543_v61  ;;  %6931 = vmatprep.mubr.msk.bf16.mxu1 %vm284_vm1, %v8699_v21 }
 0x337   : > { %v3126_v3 = vmax.f32 %v3094_v22, 0.0  ;;  %v3095_v7 = vadd.f32 %v8666_v36, %v3057_v25  ;;  %7754 = vmatprep.subr.msk.bf16.mxu1 %vm606_vm0, %v8704_v16  ;;  %v3240_v52 = vld [vmem:[#allocation3 + $0x61] sm:$0xff] }
 0x338   : > { %3161 = vst.msk [vmem:[#allocation3 + $0x91] sm:$0xff] %vm284_vm1, %v3128_v26  ;;  %v3129_v31 = vmax.f32 %v3097_v62, 0.0  ;;  %v3238_v45 = vld [vmem:[#allocation3 + $0x49] sm:$0xff] }
 0x339   : > { %3159 = vst.msk [vmem:[#allocation3 + $0x79] sm:$0xff] %vm284_vm1, %v3126_v3  ;;  %v3127_v33 = vmax.f32 %v3095_v7, 0.0  ;;  %v6907_v42 = vpop.f32.mrb[12].mxu0  ;;  %v3241_v51 = vld [vmem:[#allocation3 + $0x69] sm:$0xff] }
 0x33a   : > { %3162 = vst.msk [vmem:[#allocation3 + $0x99] sm:$0xff] %vm284_vm1, %v3129_v31  ;;  %v3062_v58 = vmul.f32 %v6907_v42, %v8661_v35  ;;  %v2931_v40 = vpop.f32.mrb[13].mxu0  ;;  %v3239_v47 = vld [vmem:[#allocation3 + $0x51] sm:$0xff]  ;;  %v8726_v43 = vpack.c.bf16 %v3241_v51, %v3240_v52 }
 0x33b   : > { %3160 = vst.msk [vmem:[#allocation3 + $0x81] sm:$0xff] %vm284_vm1, %v3127_v33  ;;  %v3060_v63 = vmul.f32 %v8661_v35, %v2931_v40  ;;  %v6908_v0 = vpop.f32.mrb[14].mxu0  ;;  %v8722_v29 = vpack.c.bf16 %v3239_v47, %v3238_v45 }
 0x33c   : > { %v3100_v53 = vadd.f32 %v8666_v36, %v3062_v58  ;;  %v3063_v32 = vmul.f32 %v6908_v0, %v8661_v35  ;;  %v2934_v37 = vpop.f32.mrb[15].mxu0 }
 0x33d   : > { %v3098_v44 = vadd.f32 %v8666_v36, %v3060_v63  ;;  %v3061_v1 = vmul.f32 %v8661_v35, %v2934_v37  ;;  %6932 = vmatmul.mubr.msk.bf16.gmra.mrb[4].mxu1 %vm284_vm1, %v8722_v29 }
 0x33e   : > { %v3132_v28 = vmax.f32 %v3100_v53, 0.0  ;;  %v3101_v10 = vadd.f32 %v8666_v36, %v3063_v32  ;;  %6935 = vmatprep.mubr.msk.bf16.mxu1 %vm284_vm1, %v8726_v43 }
 0x33f   : > { %v3130_v39 = vmax.f32 %v3098_v44, 0.0  ;;  %v3099_v27 = vadd.f32 %v8666_v36, %v3061_v1  ;;  %v3244_v34 = vld [vmem:[#allocation3 + $0x91] sm:$0xff] }
 0x340   : > { %3165 = vst.msk [vmem:[#allocation3 + $0xc1] sm:$0xff] %vm284_vm1, %v3132_v28  ;;  %v3133_v2 = vmax.f32 %v3101_v10, 0.0  ;;  %v3242_v60 = vld [vmem:[#allocation3 + $0x79] sm:$0xff] }
 0x341   : > { %3163 = vst.msk [vmem:[#allocation3 + $0xa9] sm:$0xff] %vm284_vm1, %v3130_v39  ;;  %v3131_v8 = vmax.f32 %v3099_v27, 0.0  ;;  %v6911_v38 = vpop.f32.mrb[16].mxu0  ;;  %v3245_v41 = vld [vmem:[#allocation3 + $0x99] sm:$0xff] }
 0x342   : > { %3166 = vst.msk [vmem:[#allocation3 + $0xc9] sm:$0xff] %vm284_vm1, %v3133_v2  ;;  %v3066_v59 = vmul.f32 %v6911_v38, %v8661_v35  ;;  %v2947_v50 = vpop.f32.mrb[17].mxu0  ;;  %v3243_v46 = vld [vmem:[#allocation3 + $0x81] sm:$0xff]  ;;  %v8746_v61 = vpack.c.bf16 %v3245_v41, %v3244_v34 }
 0x343   : > { %3164 = vst.msk [vmem:[#allocation3 + $0xb1] sm:$0xff] %vm284_vm1, %v3131_v8  ;;  %v3064_v49 = vmul.f32 %v8661_v35, %v2947_v50  ;;  %v6912_v30 = vpop.f32.mrb[18].mxu0  ;;  %v8742_v48 = vpack.c.bf16 %v3243_v46, %v3242_v60 }
 0x344   : > { %v3104_v54 = vadd.f32 %v8666_v36, %v3066_v59  ;;  %v3067_v57 = vmul.f32 %v6912_v30, %v8661_v35  ;;  %v2950_v55 = vpop.f32.mrb[19].mxu0 }
 0x345   : > { %v3102_v23 = vadd.f32 %v8666_v36, %v3064_v49  ;;  %v3065_v20 = vmul.f32 %v8661_v35, %v2950_v55  ;;  %6936 = vmatmul.mubr.msk.bf16.gmra.mrb[8].mxu1 %vm284_vm1, %v8742_v48 }
 0x346   : > { %v3136_v24 = vmax.f32 %v3104_v54, 0.0  ;;  %v3105_v19 = vadd.f32 %v8666_v36, %v3067_v57  ;;  %6939 = vmatprep.mubr.msk.bf16.mxu1 %vm284_vm1, %v8746_v61 }
 0x347   : > { %v3134_v22 = vmax.f32 %v3102_v23, 0.0  ;;  %v3103_v25 = vadd.f32 %v8666_v36, %v3065_v20  ;;  %v3248_v47 = vld [vmem:[#allocation3 + $0xc1] sm:$0xff] }
 0x348   : > { %3169 = vst.msk [vmem:[#allocation3 + $0xf1] sm:$0xff] %vm284_vm1, %v3136_v24  ;;  %v3137_v26 = vmax.f32 %v3105_v19, 0.0  ;;  %v3246_v42 = vld [vmem:[#allocation3 + $0xa9] sm:$0xff] }
 0x349   : > { %3167 = vst.msk [vmem:[#allocation3 + $0xd9] sm:$0xff] %vm284_vm1, %v3134_v22  ;;  %v3135_v62 = vmax.f32 %v3103_v25, 0.0  ;;  %v6915_v3 = vpop.f32.mrb[20].mxu0  ;;  %v3249_v7 = vld [vmem:[#allocation3 + $0xc9] sm:$0xff] }
 0x34a   : > { %3170 = vst.msk [vmem:[#allocation3 + $0xf9] sm:$0xff] %vm284_vm1, %v3137_v26  ;;  %v3070_v31 = vmul.f32 %v6915_v3, %v8661_v35  ;;  %v2963_v33 = vpop.f32.mrb[21].mxu0  ;;  %v3247_v51 = vld [vmem:[#allocation3 + $0xb1] sm:$0xff]  ;;  %v8766_v53 = vpack.c.bf16 %v3249_v7, %v3248_v47 }
 0x34b   : > { %3168 = vst.msk [vmem:[#allocation3 + $0xe1] sm:$0xff] %vm284_vm1, %v3135_v62  ;;  %v3068_v58 = vmul.f32 %v8661_v35, %v2963_v33  ;;  %v6916_v40 = vpop.f32.mrb[22].mxu0  ;;  %v8762_v45 = vpack.c.bf16 %v3247_v51, %v3246_v42 }
 0x34c   : > { %v3108_v63 = vadd.f32 %v8666_v36, %v3070_v31  ;;  %v3071_v0 = vmul.f32 %v6916_v40, %v8661_v35  ;;  %v2966_v52 = vpop.f32.mrb[23].mxu0 }
 0x34d   : > { %v3106_v32 = vadd.f32 %v8666_v36, %v3068_v58  ;;  %v3069_v37 = vmul.f32 %v8661_v35, %v2966_v52  ;;  %6940 = vmatmul.mubr.msk.bf16.gmra.mrb[12].mxu1 %vm284_vm1, %v8762_v45 }
 0x34e   : > { %v3140_v44 = vmax.f32 %v3108_v63, 0.0  ;;  %v3109_v1 = vadd.f32 %v8666_v36, %v3071_v0  ;;  %6943 = vmatprep.mubr.msk.bf16.mxu1 %vm284_vm1, %v8766_v53 }
 0x34f   : > { %v3138_v28 = vmax.f32 %v3106_v32, 0.0  ;;  %v3107_v10 = vadd.f32 %v8666_v36, %v3069_v37  ;;  %v3252_v30 = vld [vmem:[#allocation3 + $0xf1] sm:$0xff] }
 0x350   : > { %3173 = vst.msk [vmem:[#allocation3 + $0x121] sm:$0xff] %vm284_vm1, %v3140_v44  ;;  %v3141_v39 = vmax.f32 %v3109_v1, 0.0  ;;  %v3250_v59 = vld [vmem:[#allocation3 + $0xd9] sm:$0xff] }
 0x351   : > { %3171 = vst.msk [vmem:[#allocation3 + $0x109] sm:$0xff] %vm284_vm1, %v3138_v28  ;;  %v3139_v27 = vmax.f32 %v3107_v10, 0.0  ;;  %v6919_v2 = vpop.f32.mrb[24].mxu0  ;;  %v3253_v8 = vld [vmem:[#allocation3 + $0xf9] sm:$0xff] }
 0x352   : > { %3174 = vst.msk [vmem:[#allocation3 + $0x129] sm:$0xff] %vm284_vm1, %v3141_v39  ;;  %v3074_v38 = vmul.f32 %v6919_v2, %v8661_v35  ;;  %v2979_v41 = vpop.f32.mrb[25].mxu0  ;;  %v3251_v50 = vld [vmem:[#allocation3 + $0xe1] sm:$0xff]  ;;  %v8786_v55 = vpack.c.bf16 %v3253_v8, %v3252_v30 }
 0x353   : > { %3172 = vst.msk [vmem:[#allocation3 + $0x111] sm:$0xff] %vm284_vm1, %v3139_v27  ;;  %v3072_v60 = vmul.f32 %v8661_v35, %v2979_v41  ;;  %v6920_v46 = vpop.f32.mrb[26].mxu0  ;;  %v8782_v49 = vpack.c.bf16 %v3251_v50, %v3250_v59 }
 0x354   : > { %v3112_v34 = vadd.f32 %v8666_v36, %v3074_v38  ;;  %v3075_v54 = vmul.f32 %v6920_v46, %v8661_v35  ;;  %v2982_v57 = vpop.f32.mrb[27].mxu0  ;;  %v3184_v46 = vld [vmem:[#allocation3 + $0x8] sm:$0xff] }
 0x355   : > { %v3110_v23 = vadd.f32 %v8666_v36, %v3072_v60  ;;  %v3073_v20 = vmul.f32 %v8661_v35, %v2982_v57  ;;  %6944 = vmatmul.mubr.msk.bf16.gmra.mrb[16].mxu1 %vm284_vm1, %v8782_v49 }
 0x356   : > { %v3144_v24 = vmax.f32 %v3112_v34, 0.0  ;;  %v3113_v19 = vadd.f32 %v8666_v36, %v3075_v54  ;;  %6947 = vmatprep.mubr.msk.bf16.mxu1 %vm284_vm1, %v8786_v55 }
 0x357   : > { %v3142_v22 = vmax.f32 %v3110_v23, 0.0  ;;  %v3111_v25 = vadd.f32 %v8666_v36, %v3073_v20  ;;  %v3256_v63 = vld [vmem:[#allocation3 + $0x121] sm:$0xff]  ;;  %v3188_v20 = vld [vmem:[#allocation3 + $0x38] sm:$0xff] }
 0x358   : > { %3177 = vst.msk [vmem:[#allocation3 + $0x151] sm:$0xff] %vm284_vm1, %v3144_v24  ;;  %v3145_v26 = vmax.f32 %v3113_v19, 0.0  ;;  %v3254_v42 = vld [vmem:[#allocation3 + $0x109] sm:$0xff]  ;;  %v3186_v23 = vld [vmem:[#allocation3 + $0x20] sm:$0xff]  ;;  %v3185_v24 = vld [vmem:[#allocation3 + $0x18] sm:$0xff] }
 0x359   : > { %3175 = vst.msk [vmem:[#allocation3 + $0x139] sm:$0xff] %vm284_vm1, %v3142_v22  ;;  %v3143_v62 = vmax.f32 %v3111_v25, 0.0  ;;  %v6923_v3 = vpop.f32.mrb[28].mxu0  ;;  %v3257_v7 = vld [vmem:[#allocation3 + $0x129] sm:$0xff]  ;;  %v8833_v19 = vpack.c.bf16 %v3186_v23, %v3185_v24  ;;  %v3805_v22 = vsel %vm606_vm0, %v8704_v16, 0 }
 0x35a   : > { %3178 = vst.msk [vmem:[#allocation3 + $0x159] sm:$0xff] %vm284_vm1, %v3145_v26  ;;  %v3078_v31 = vmul.f32 %v6923_v3, %v8661_v35  ;;  %v2995_v33 = vpop.f32.mrb[29].mxu0  ;;  %v3255_v51 = vld [vmem:[#allocation3 + $0x111] sm:$0xff]  ;;  %v8806_v37 = vpack.c.bf16 %v3257_v7, %v3256_v63  ;;  %v3192_v16 = vld [vmem:[#allocation3 + $0x68] sm:$0xff] }
 0x35b   : > { %3176 = vst.msk [vmem:[#allocation3 + $0x141] sm:$0xff] %vm284_vm1, %v3143_v62  ;;  %v3076_v58 = vmul.f32 %v8661_v35, %v2995_v33  ;;  %v6924_v40 = vpop.f32.mrb[30].mxu0  ;;  %v8802_v47 = vpack.c.bf16 %v3255_v51, %v3254_v42  ;;  %v3187_v25 = vld [vmem:[#allocation3 + $0x30] sm:$0xff]  ;;  %v8842_v62 = vld [vmem:[%s9364_s4 + $0xc] sm:$0xf]  ;;  %v3189_v7 = vld [vmem:[#allocation3 + $0x48] sm:$0xff] }
 0x35c   : > { %v3116_v0 = vadd.f32 %v8666_v36, %v3078_v31  ;;  %v3079_v52 = vmul.f32 %v6924_v40, %v8661_v35  ;;  %v2998_v32 = vpop.f32.mrb[31].mxu0  ;;  %v8837_v26 = vpack.c.bf16 %v3188_v20, %v3187_v25  ;;  %v3190_v3 = vld [vmem:[#allocation3 + $0x50] sm:$0xff]  ;;  %v3191_v33 = vld [vmem:[#allocation3 + $0x60] sm:$0xff]  ;;  %v3193_v40 = vld [vmem:[#allocation3 + $0x78] sm:$0xff] }
 0x35d   : > { %v3114_v44 = vadd.f32 %v8666_v36, %v3076_v58  ;;  %v3077_v1 = vmul.f32 %v8661_v35, %v2998_v32  ;;  %6948 = vmatmul.mubr.msk.bf16.gmra.mrb[20].mxu1 %vm284_vm1, %v8802_v47  ;;  %v8850_v31 = vpack.c.bf16 %v3190_v3, %v3189_v7  ;;  %v8852_v42 = vpack.c.bf16 %v3192_v16, %v3191_v33  ;;  %v3194_v51 = vld [vmem:[#allocation3 + $0x80] sm:$0xff]  ;;  %v3196_v58 = vld [vmem:[#allocation3 + $0x98] sm:$0xff]  ;;  %v3198_v32 = vld [vmem:[#allocation3 + $0xb0] sm:$0xff] }
 0x35e   : > { %v3148_v28 = vmax.f32 %v3116_v0, 0.0  ;;  %v3117_v10 = vadd.f32 %v8666_v36, %v3079_v52  ;;  %6951 = vmatprep.mubr.msk.bf16.mxu1 %vm284_vm1, %v8806_v37  ;;  %v8858_v63 = vpack.c.bf16 %v3194_v51, %v3193_v40  ;;  %v3195_v0 = vld [vmem:[#allocation3 + $0x90] sm:$0xff]  ;;  %v3706_v16 = vld [vmem:[#allocation3 + $0x2] sm:$0xff] }
 0x35f   : > { %v3146_v39 = vmax.f32 %v3114_v44, 0.0  ;;  %v3115_v27 = vadd.f32 %v8666_v36, %v3077_v1  ;;  %v3260_v50 = vld [vmem:[#allocation3 + $0x151] sm:$0xff]  ;;  %v3183_v36 = vld [vmem:[#allocation3] sm:$0xff]  ;;  %v8860_v52 = vpack.c.bf16 %v3196_v58, %v3195_v0  ;;  %v3200_v44 = vld [vmem:[#allocation3 + $0xc8] sm:$0xff] }
 0x360   : > { %3181 = vst.msk [vmem:[#allocation3 + $0x181] sm:$0xff] %vm284_vm1, %v3148_v28  ;;  %v3149_v2 = vmax.f32 %v3117_v10, 0.0  ;;  %v3258_v35 = vld [vmem:[#allocation3 + $0x139] sm:$0xff]  ;;  %v3215_v54 = vpack.c.bf16 %v3184_v46, %v3183_v36  ;;  %v3197_v1 = vld [vmem:[#allocation3 + $0xa8] sm:$0xff]  ;;  %v3211_v25 = vld [vmem:[#allocation3 + $0x150] sm:$0xff] }
 0x361   : > { %3179 = vst.msk [vmem:[#allocation3 + $0x169] sm:$0xff] %vm284_vm1, %v3146_v39  ;;  %v3147_v8 = vmax.f32 %v3115_v27, 0.0  ;;  %v3261_v38 = vld [vmem:[#allocation3 + $0x159] sm:$0xff]  ;;  %v8866_v28 = vpack.c.bf16 %v3198_v32, %v3197_v1  ;;  %v3208_v36 = vld [vmem:[#allocation3 + $0x128] sm:$0xff] }
 0x362   : > { %3182 = vst.msk [vmem:[#allocation3 + $0x189] sm:$0xff] %vm284_vm1, %v3149_v2  ;;  %v3259_v41 = vld [vmem:[#allocation3 + $0x141] sm:$0xff]  ;;  %v8822_v60 = vpack.c.bf16 %v3261_v38, %v3260_v50  ;;  %v3204_v2 = vld [vmem:[#allocation3 + $0xf8] sm:$0xff]  ;;  %v3206_v50 = vld [vmem:[#allocation3 + $0x110] sm:$0xff] }
 0x363   : > { %3180 = vst.msk [vmem:[#allocation3 + $0x171] sm:$0xff] %vm284_vm1, %v3147_v8  ;;  %v8820_v59 = vpack.c.bf16 %v3259_v41, %v3258_v35  ;;  %v3199_v10 = vld [vmem:[#allocation3 + $0xc0] sm:$0xff]  ;;  %v3201_v8 = vld [vmem:[#allocation3 + $0xd8] sm:$0xff]  ;;  %v3203_v35 = vld [vmem:[#allocation3 + $0xf0] sm:$0xff] }
 0x364   : > { %v8868_v39 = vpack.c.bf16 %v3200_v44, %v3199_v10  ;;  %v3202_v27 = vld [vmem:[#allocation3 + $0xe0] sm:$0xff]  ;;  %v8876_v41 = vpack.c.bf16 %v3204_v2, %v3203_v35  ;;  %v3205_v46 = vld [vmem:[#allocation3 + $0x108] sm:$0xff]  ;;  %v3212_v20 = vld [vmem:[#allocation3 + $0x158] sm:$0xff] }
 0x365   : > { %6952 = vmatmul.mubr.msk.bf16.gmra.mrb[24].mxu1 %vm284_vm1, %v8820_v59  ;;  %v8874_v38 = vpack.c.bf16 %v3202_v27, %v3201_v8  ;;  %v3210_v23 = vld [vmem:[#allocation3 + $0x140] sm:$0xff]  ;;  %v3209_v24 = vld [vmem:[#allocation3 + $0x138] sm:$0xff]  ;;  %v8892_v3 = vpack.c.bf16 %v3212_v20, %v3211_v25  ;;  %v3707_v7 = vld [vmem:[#allocation3 + $0xa] sm:$0xff]  ;;  %v4099_v27 = vsel %vm606_vm0, %v8842_v62, 0 }
 0x366   : > { %6955 = vmatprep.mubr.msk.bf16.mxu1 %vm284_vm1, %v8822_v60  ;;  %v3738_v58 = vpack.c.bf16 %v3707_v7, %v3706_v16  ;;  %v3708_v0 = vld [vmem:[#allocation3 + $0x1a] sm:$0xff]  ;;  %v3709_v32 = vld [vmem:[#allocation3 + $0x22] sm:$0xff]  ;;  %v3710_v44 = vld [vmem:[#allocation3 + $0x32] sm:$0xff] }
 0x367   : > { %v3711_v1 = vld [vmem:[#allocation3 + $0x3a] sm:$0xff]  ;;  %v8903_v10 = vpack.c.bf16 %v3709_v32, %v3708_v0  ;;  %v3712_v35 = vld [vmem:[#allocation3 + $0x4a] sm:$0xff]  ;;  %v3717_v20 = vld [vmem:[#allocation3 + $0x82] sm:$0xff] }
 0x368   : > { %v3262_v30 = vld [vmem:[#allocation3 + $0x169] sm:$0xff]  ;;  %v8907_v2 = vpack.c.bf16 %v3711_v1, %v3710_v44  ;;  %v6222_v8 = vld [vmem:[%s9364_s4 + $0x10] sm:$0xf] }
 0x369   : > { %v3213_v51 = vld [vmem:[#allocation3 + $0x168] sm:$0xff]  ;;  %v3719_v25 = vld [vmem:[#allocation3 + $0x9a] sm:$0xff] }
 0x36a   : > { %v3263_v34 = vld [vmem:[#allocation3 + $0x171] sm:$0xff]  ;;  %v3724_v1 = vld [vmem:[#allocation3 + $0xda] sm:$0xff] }
 0x36b   : > { %v8828_v57 = vpack.c.bf16 %v3263_v34, %v3262_v30  ;;  %v8882_v30 = vpack.c.bf16 %v3206_v50, %v3205_v46  ;;  %v3207_v34 = vld [vmem:[#allocation3 + $0x120] sm:$0xff]  ;;  %v3214_v33 = vld [vmem:[#allocation3 + $0x170] sm:$0xff] }
 0x36c   : > { %v8898_v40 = vpack.c.bf16 %v3214_v33, %v3213_v51  ;;  %v3713_v50 = vld [vmem:[#allocation3 + $0x52] sm:$0xff]  ;;  %v3715_v46 = vld [vmem:[#allocation3 + $0x6a] sm:$0xff] }
 0x36d   : > { %6956 = vmatmul.mubr.msk.bf16.gmra.mrb[28].mxu1 %vm284_vm1, %v8828_v57  ;;  %v3720_v33 = vld [vmem:[#allocation3 + $0xaa] sm:$0xff]  ;;  %v3721_v51 = vld [vmem:[#allocation3 + $0xb2] sm:$0xff] }
 0x36e   : > { %6961 = vmatprep.mubr.msk.bf16.mxu1 %vm284_vm1, %v3215_v54  ;;  %v8884_v54 = vpack.c.bf16 %v3208_v36, %v3207_v34  ;;  %v3714_v36 = vld [vmem:[#allocation3 + $0x62] sm:$0xff]  ;;  %v3723_v0 = vld [vmem:[#allocation3 + $0xca] sm:$0xff]  ;;  %v8933_v32 = vpack.c.bf16 %v3721_v51, %v3720_v33 }
 0x36f   : > { %v8919_v34 = vpack.c.bf16 %v3715_v46, %v3714_v36 }
 0x375   : > { %6962 = vmatmul.mubr.msk.bf16.vlgmr.msra.gmra.mrb[0].mxu1 %vm284_vm1, %v8833_v19 }
 0x376   : > { %6994 = vmatpush3.bf16.msra.mxu1 %v3805_v22  ;;  %6965 = vmatprep.mubr.msk.bf16.mxu1 %vm284_vm1, %v8837_v26  ;;  %v8890_v22 = vpack.c.bf16 %v3210_v23, %v3209_v24  ;;  %v3716_v23 = vld [vmem:[#allocation3 + $0x7a] sm:$0xff]  ;;  %v3718_v24 = vld [vmem:[#allocation3 + $0x92] sm:$0xff] }
 0x377   : > { %7755 = vmatprep.subr.msk.bf16.mxu1 %vm606_vm0, %v8842_v62  ;;  %v8917_v62 = vpack.c.bf16 %v3713_v50, %v3712_v35  ;;  %v8925_v16 = vpack.c.bf16 %v3717_v20, %v3716_v23  ;;  %v8927_v7 = vpack.c.bf16 %v3719_v25, %v3718_v24  ;;  %v3726_v35 = vld [vmem:[#allocation3 + $0xf2] sm:$0xff]  ;;  %v3727_v50 = vld [vmem:[#allocation3 + $0xfa] sm:$0xff]  ;;  %v3728_v23 = vld [vmem:[#allocation3 + $0x10a] sm:$0xff] }
 0x378   : > { %v8943_v46 = vpack.c.bf16 %v3727_v50, %v3726_v35  ;;  %v3729_v20 = vld [vmem:[#allocation3 + $0x112] sm:$0xff]  ;;  %v3730_v24 = vld [vmem:[#allocation3 + $0x122] sm:$0xff]  ;;  %v3731_v25 = vld [vmem:[#allocation3 + $0x12a] sm:$0xff] }
 0x379   : > { %v8949_v33 = vpack.c.bf16 %v3729_v20, %v3728_v23  ;;  %v8951_v51 = vpack.c.bf16 %v3731_v25, %v3730_v24  ;;  %v3736_v23 = vld [vmem:[#allocation3 + $0x16a] sm:$0xff]  ;;  %v3737_v20 = vld [vmem:[#allocation3 + $0x172] sm:$0xff]  ;;  %v4393_v25 = vsel %vm606_vm0, %v6222_v8, 0 }
 0x37a   : > { %v8965_v24 = vpack.c.bf16 %v3737_v20, %v3736_v23 }
 0x37d   : > { %6966 = vmatmul.mubr.msk.bf16.gmra.mrb[4].mxu1 %vm284_vm1, %v8850_v31 }
 0x37e   : > { %6969 = vmatprep.mubr.msk.bf16.mxu1 %vm284_vm1, %v8852_v42 }
 0x385   : > { %6970 = vmatmul.mubr.msk.bf16.gmra.mrb[8].mxu1 %vm284_vm1, %v8858_v63 }
 0x386   : > { %6973 = vmatprep.mubr.msk.bf16.mxu1 %vm284_vm1, %v8860_v52 }
 0x38d   : > { %6974 = vmatmul.mubr.msk.bf16.gmra.mrb[12].mxu1 %vm284_vm1, %v8866_v28 }
 0x38e   : > { %6977 = vmatprep.mubr.msk.bf16.mxu1 %vm284_vm1, %v8868_v39 }
 0x395   : > { %6978 = vmatmul.mubr.msk.bf16.gmra.mrb[16].mxu1 %vm284_vm1, %v8874_v38 }
 0x396   : > { %6981 = vmatprep.mubr.msk.bf16.mxu1 %vm284_vm1, %v8876_v41 }
 0x39d   : > { %6982 = vmatmul.mubr.msk.bf16.gmra.mrb[20].mxu1 %vm284_vm1, %v8882_v30 }
 0x39e   : > { %6985 = vmatprep.mubr.msk.bf16.mxu1 %vm284_vm1, %v8884_v54 }
 0x3a5   : > { %6986 = vmatmul.mubr.msk.bf16.gmra.mrb[24].mxu1 %vm284_vm1, %v8890_v22 }
 0x3a6   : > { %6989 = vmatprep.mubr.msk.bf16.mxu1 %vm284_vm1, %v8892_v3 }
 0x3ad   : > { %6990 = vmatmul.mubr.msk.bf16.gmra.mrb[28].mxu1 %vm284_vm1, %v8898_v40 }
 0x3ae   : > { %6995 = vmatprep.mubr.msk.bf16.mxu1 %vm284_vm1, %v3738_v58  ;;  %v3722_v58 = vld [vmem:[#allocation3 + $0xc2] sm:$0xff] }
 0x3af   : > { %v8935_v44 = vpack.c.bf16 %v3723_v0, %v3722_v58  ;;  %v3732_v58 = vld [vmem:[#allocation3 + $0x13a] sm:$0xff]  ;;  %v3733_v0 = vld [vmem:[#allocation3 + $0x142] sm:$0xff] }
 0x3b0   : > { %v8957_v35 = vpack.c.bf16 %v3733_v0, %v3732_v58  ;;  %v6239_v58 = vld [vmem:[%s9364_s4 + $0x14] sm:$0xf] }
 0x3b5   : > { %6996 = vmatmul.mubr.msk.bf16.vlgmr.msra.gmra.mrb[0].mxu1 %vm284_vm1, %v8903_v10 }
 0x3b6   : > { %7028 = vmatpush3.bf16.msra.mxu1 %v4099_v27  ;;  %6999 = vmatprep.mubr.msk.bf16.mxu1 %vm284_vm1, %v8907_v2  ;;  %v3725_v27 = vld [vmem:[#allocation3 + $0xe2] sm:$0xff] }
 0x3b7   : > { %7756 = vmatprep.subr.msk.bf16.mxu1 %vm606_vm0, %v6222_v8  ;;  %v8941_v36 = vpack.c.bf16 %v3725_v27, %v3724_v1  ;;  %v3734_v1 = vld [vmem:[#allocation3 + $0x152] sm:$0xff]  ;;  %v3735_v27 = vld [vmem:[#allocation3 + $0x15a] sm:$0xff] }
 0x3b8   : > { %v8959_v50 = vpack.c.bf16 %v3735_v27, %v3734_v1  ;;  %v4030_v8 = vld [vmem:[#allocation3 + $0x180] sm:$0xff]  ;;  %v4687_v1 = vsel %vm606_vm0, %v6239_v58, 0  ;;  %v6256_v27 = vld [vmem:[%s9364_s4 + $0x18] sm:$0xf] }
 0x3bd   : > { %7000 = vmatmul.mubr.msk.bf16.gmra.mrb[4].mxu1 %vm284_vm1, %v8917_v62 }
 0x3be   : > { %7003 = vmatprep.mubr.msk.bf16.mxu1 %vm284_vm1, %v8919_v34 }
 0x3c5   : > { %7004 = vmatmul.mubr.msk.bf16.gmra.mrb[8].mxu1 %vm284_vm1, %v8925_v16 }
 0x3c6   : > { %7007 = vmatprep.mubr.msk.bf16.mxu1 %vm284_vm1, %v8927_v7 }
 0x3cd   : > { %7008 = vmatmul.mubr.msk.bf16.gmra.mrb[12].mxu1 %vm284_vm1, %v8933_v32 }
 0x3ce   : > { %7011 = vmatprep.mubr.msk.bf16.mxu1 %vm284_vm1, %v8935_v44 }
 0x3d5   : > { %7012 = vmatmul.mubr.msk.bf16.gmra.mrb[16].mxu1 %vm284_vm1, %v8941_v36 }
 0x3d6   : > { %7015 = vmatprep.mubr.msk.bf16.mxu1 %vm284_vm1, %v8943_v46 }
 0x3dd   : > { %7016 = vmatmul.mubr.msk.bf16.gmra.mrb[20].mxu1 %vm284_vm1, %v8949_v33 }
 0x3de   : > { %7019 = vmatprep.mubr.msk.bf16.mxu1 %vm284_vm1, %v8951_v51 }
 0x3e5   : > { %7020 = vmatmul.mubr.msk.bf16.gmra.mrb[24].mxu1 %vm284_vm1, %v8957_v35 }
 0x3e6   : > { %7023 = vmatprep.mubr.msk.bf16.mxu1 %vm284_vm1, %v8959_v50 }
 0x3ed   : > { %7024 = vmatmul.mubr.msk.bf16.gmra.mrb[28].mxu1 %vm284_vm1, %v8965_v24 }
 0x3ee   : > { %7029 = vmatprep.mubr.msk.bf16.mxu1 %vm284_vm1, %v8833_v19  ;;  %v4031_v19 = vld [vmem:[#allocation3 + $0x188] sm:$0xff] }
 0x3ef   : > { %v9004_v0 = vpack.c.bf16 %v4031_v19, %v4030_v8  ;;  %v5183_v19 = vld [vmem:[#allocation3 + $0x79] sm:$0xff] }
 0x3f5   : > { %7030 = vmatmul.mubr.msk.bf16.vlgmr.msra.gmra.mrb[0].mxu1 %vm284_vm1, %v8837_v26 }
 0x3f6   : > { %7062 = vmatpush3.bf16.msra.mxu1 %v4393_v25  ;;  %7033 = vmatprep.mubr.msk.bf16.mxu1 %vm284_vm1, %v8850_v31  ;;  %v6290_v25 = vld [vmem:[%s9364_s4 + $0x20] sm:$0xf] }
 0x3f7   : > { %7757 = vmatprep.subr.msk.bf16.mxu1 %vm606_vm0, %v6239_v58  ;;  %v5186_v58 = vld [vmem:[#allocation3 + $0x99] sm:$0xff] }
 0x3fd   : > { %7034 = vmatmul.mubr.msk.bf16.gmra.mrb[4].mxu1 %vm284_vm1, %v8852_v42 }
 0x3fe   : > { %7037 = vmatprep.mubr.msk.bf16.mxu1 %vm284_vm1, %v8858_v63 }
 0x405   : > { %7038 = vmatmul.mubr.msk.bf16.gmra.mrb[8].mxu1 %vm284_vm1, %v8860_v52 }
 0x406   : > { %7041 = vmatprep.mubr.msk.bf16.mxu1 %vm284_vm1, %v8866_v28 }
 0x40d   : > { %7042 = vmatmul.mubr.msk.bf16.gmra.mrb[12].mxu1 %vm284_vm1, %v8868_v39 }
 0x40e   : > { %7045 = vmatprep.mubr.msk.bf16.mxu1 %vm284_vm1, %v8874_v38 }
 0x415   : > { %7046 = vmatmul.mubr.msk.bf16.gmra.mrb[16].mxu1 %vm284_vm1, %v8876_v41 }
 0x416   : > { %7049 = vmatprep.mubr.msk.bf16.mxu1 %vm284_vm1, %v8882_v30 }
 0x41d   : > { %7050 = vmatmul.mubr.msk.bf16.gmra.mrb[20].mxu1 %vm284_vm1, %v8884_v54 }
 0x41e   : > { %7053 = vmatprep.mubr.msk.bf16.mxu1 %vm284_vm1, %v8890_v22 }
 0x425   : > { %7054 = vmatmul.mubr.msk.bf16.gmra.mrb[24].mxu1 %vm284_vm1, %v8892_v3 }
 0x426   : > { %7057 = vmatprep.mubr.msk.bf16.mxu1 %vm284_vm1, %v8898_v40 }
 0x42d   : > { %7058 = vmatmul.mubr.msk.bf16.gmra.mrb[28].mxu1 %vm284_vm1, %v9004_v0 }
 0x42e   : > { %7063 = vmatprep.mubr.msk.bf16.mxu1 %vm284_vm1, %v8694_v56  ;;  %v4325_v56 = vld [vmem:[#allocation3 + $0x189] sm:$0xff] }
 0x435   : > { %7064 = vmatmul.mubr.msk.bf16.vlgmr.msra.gmra.mrb[0].mxu1 %vm284_vm1, %v8699_v21  ;;  %v4324_v21 = vld [vmem:[#allocation3 + $0x181] sm:$0xff] }
 0x436   : > { %7096 = vmatpush3.bf16.msra.mxu1 %v4687_v1  ;;  %7067 = vmatprep.mubr.msk.bf16.mxu1 %vm284_vm1, %v8722_v29  ;;  %v9043_v29 = vpack.c.bf16 %v4325_v56, %v4324_v21 }
 0x437   : > { %7758 = vmatprep.subr.msk.bf16.mxu1 %vm606_vm0, %v6256_v27 }
 0x43d   : > { %7068 = vmatmul.mubr.msk.bf16.gmra.mrb[4].mxu1 %vm284_vm1, %v8726_v43  ;;  %v4982_v43 = vsel %vm606_vm0, %v6256_v27, 0 }
 0x43e   : > { %7071 = vmatprep.mubr.msk.bf16.mxu1 %vm284_vm1, %v8742_v48  ;;  %v6273_v48 = vld [vmem:[%s9364_s4 + $0x1c] sm:$0xf] }
 0x43f   : > { %v5276_v20 = vsel %vm606_vm0, %v6273_v48, 0 }
 0x445   : > { %7072 = vmatmul.mubr.msk.bf16.gmra.mrb[8].mxu1 %vm284_vm1, %v8746_v61  ;;  %v4618_v61 = vld [vmem:[#allocation3 + $0x182] sm:$0xff] }
 0x446   : > { %7075 = vmatprep.mubr.msk.bf16.mxu1 %vm284_vm1, %v8762_v45 }
 0x44d   : > { %7076 = vmatmul.mubr.msk.bf16.gmra.mrb[12].mxu1 %vm284_vm1, %v8766_v53 }
 0x44e   : > { %7079 = vmatprep.mubr.msk.bf16.mxu1 %vm284_vm1, %v8782_v49 }
 0x455   : > { %7080 = vmatmul.mubr.msk.bf16.gmra.mrb[16].mxu1 %vm284_vm1, %v8786_v55 }
 0x456   : > { %7083 = vmatprep.mubr.msk.bf16.mxu1 %vm284_vm1, %v8802_v47 }
 0x45d   : > { %7084 = vmatmul.mubr.msk.bf16.gmra.mrb[20].mxu1 %vm284_vm1, %v8806_v37 }
 0x45e   : > { %7087 = vmatprep.mubr.msk.bf16.mxu1 %vm284_vm1, %v8820_v59 }
 0x465   : > { %7088 = vmatmul.mubr.msk.bf16.gmra.mrb[24].mxu1 %vm284_vm1, %v8822_v60 }
 0x466   : > { %7091 = vmatprep.mubr.msk.bf16.mxu1 %vm284_vm1, %v8828_v57 }
 0x46d   : > { %7092 = vmatmul.mubr.msk.bf16.gmra.mrb[28].mxu1 %vm284_vm1, %v9043_v29 }
 0x46e   : > { %7097 = vmatprep.mubr.msk.bf16.mxu1 %vm284_vm1, %v8903_v10  ;;  %v4619_v10 = vld [vmem:[#allocation3 + $0x18a] sm:$0xff] }
 0x46f   : > { %v9082_v23 = vpack.c.bf16 %v4619_v10, %v4618_v61 }
 0x475   : > { %7098 = vmatmul.mubr.msk.bf16.vlgmr.msra.gmra.mrb[0].mxu1 %vm284_vm1, %v8907_v2 }
 0x476   : > { %7130 = vmatpush3.bf16.msra.mxu1 %v4982_v43  ;;  %7101 = vmatprep.mubr.msk.bf16.mxu1 %vm284_vm1, %v8917_v62 }
 0x477   : > { %7759 = vmatprep.subr.msk.bf16.mxu1 %vm606_vm0, %v6273_v48 }
 0x47d   : > { %7102 = vmatmul.mubr.msk.bf16.gmra.mrb[4].mxu1 %vm284_vm1, %v8919_v34 }
 0x47e   : > { %7105 = vmatprep.mubr.msk.bf16.mxu1 %vm284_vm1, %v8925_v16 }
 0x485   : > { %7106 = vmatmul.mubr.msk.bf16.gmra.mrb[8].mxu1 %vm284_vm1, %v8927_v7 }
 0x486   : > { %7109 = vmatprep.mubr.msk.bf16.mxu1 %vm284_vm1, %v8933_v32 }
 0x48d   : > { %7110 = vmatmul.mubr.msk.bf16.gmra.mrb[12].mxu1 %vm284_vm1, %v8935_v44 }
 0x48e   : > { %7113 = vmatprep.mubr.msk.bf16.mxu1 %vm284_vm1, %v8941_v36 }
 0x495   : > { %7114 = vmatmul.mubr.msk.bf16.gmra.mrb[16].mxu1 %vm284_vm1, %v8943_v46 }
 0x496   : > { %7117 = vmatprep.mubr.msk.bf16.mxu1 %vm284_vm1, %v8949_v33 }
 0x49d   : > { %7118 = vmatmul.mubr.msk.bf16.gmra.mrb[20].mxu1 %vm284_vm1, %v8951_v51 }
 0x49e   : > { %7121 = vmatprep.mubr.msk.bf16.mxu1 %vm284_vm1, %v8957_v35 }
 0x4a5   : > { %7122 = vmatmul.mubr.msk.bf16.gmra.mrb[24].mxu1 %vm284_vm1, %v8959_v50 }
 0x4a6   : > { %7125 = vmatprep.mubr.msk.bf16.mxu1 %vm284_vm1, %v8965_v24 }
 0x4ad   : > { %7126 = vmatmul.mubr.msk.bf16.gmra.mrb[28].mxu1 %vm284_vm1, %v9082_v23 }
 0x4ae   : > { %7131 = vmatprep.mubr.msk.bf16.mxu1 %vm284_vm1, %v8837_v26  ;;  %v4913_v26 = vld [vmem:[#allocation3 + $0x198] sm:$0xff] }
 0x4b5   : > { %7132 = vmatmul.mubr.msk.bf16.vlgmr.msra.gmra.mrb[0].mxu1 %vm284_vm1, %v8850_v31  ;;  %v4914_v31 = vld [vmem:[#allocation3 + $0x1a0] sm:$0xff] }
 0x4b6   : > { %7164 = vmatpush3.bf16.msra.mxu1 %v5276_v20  ;;  %7135 = vmatprep.mubr.msk.bf16.mxu1 %vm284_vm1, %v8852_v42  ;;  %v4930_v42 = vpack.c.bf16 %v4914_v31, %v4913_v26 }
 0x4b7   : > { %7760 = vmatprep.subr.msk.bf16.mxu1 %vm606_vm0, %v6290_v25 }
 0x4bd   : > { %7136 = vmatmul.mubr.msk.bf16.gmra.mrb[4].mxu1 %vm284_vm1, %v8858_v63  ;;  %v5178_v63 = vld [vmem:[#allocation3 + $0x39] sm:$0xff] }
 0x4be   : > { %7139 = vmatprep.mubr.msk.bf16.mxu1 %vm284_vm1, %v8860_v52  ;;  %v5177_v52 = vld [vmem:[#allocation3 + $0x31] sm:$0xff] }
 0x4c5   : > { %7140 = vmatmul.mubr.msk.bf16.gmra.mrb[8].mxu1 %vm284_vm1, %v8866_v28  ;;  %v5209_v28 = vpack.c.bf16 %v5178_v63, %v5177_v52 }
 0x4c6   : > { %7143 = vmatprep.mubr.msk.bf16.mxu1 %vm284_vm1, %v8868_v39  ;;  %v5180_v39 = vld [vmem:[#allocation3 + $0x51] sm:$0xff] }
 0x4cd   : > { %7144 = vmatmul.mubr.msk.bf16.gmra.mrb[12].mxu1 %vm284_vm1, %v8874_v38  ;;  %v5182_v38 = vld [vmem:[#allocation3 + $0x69] sm:$0xff] }
 0x4ce   : > { %7147 = vmatprep.mubr.msk.bf16.mxu1 %vm284_vm1, %v8876_v41  ;;  %v5179_v41 = vld [vmem:[#allocation3 + $0x49] sm:$0xff] }
 0x4d5   : > { %7148 = vmatmul.mubr.msk.bf16.gmra.mrb[16].mxu1 %vm284_vm1, %v8882_v30  ;;  %v5210_v30 = vpack.c.bf16 %v5180_v39, %v5179_v41 }
 0x4d6   : > { %7151 = vmatprep.mubr.msk.bf16.mxu1 %vm284_vm1, %v8884_v54  ;;  %v5570_v54 = vsel %vm606_vm0, %v6290_v25, 0 }
 0x4dd   : > { %7152 = vmatmul.mubr.msk.bf16.gmra.mrb[20].mxu1 %vm284_vm1, %v8890_v22  ;;  %v5181_v22 = vld [vmem:[#allocation3 + $0x61] sm:$0xff] }
 0x4de   : > { %7155 = vmatprep.mubr.msk.bf16.mxu1 %vm284_vm1, %v8892_v3  ;;  %v5211_v3 = vpack.c.bf16 %v5182_v38, %v5181_v22 }
 0x4e5   : > { %7156 = vmatmul.mubr.msk.bf16.gmra.mrb[24].mxu1 %vm284_vm1, %v8898_v40  ;;  %v5184_v40 = vld [vmem:[#allocation3 + $0x81] sm:$0xff] }
 0x4e6   : > { %7159 = vmatprep.mubr.msk.bf16.mxu1 %vm284_vm1, %v9004_v0  ;;  %v5212_v8 = vpack.c.bf16 %v5184_v40, %v5183_v19  ;;  %v5185_v0 = vld [vmem:[#allocation3 + $0x91] sm:$0xff] }
 0x4e7   : > { %v5213_v1 = vpack.c.bf16 %v5186_v58, %v5185_v0 }
 0x4ed   : > { %7160 = vmatmul.mubr.msk.bf16.gmra.mrb[28].mxu1 %vm284_vm1, %v4930_v42 }
 0x4ee   : > { %7165 = vmatprep.mubr.msk.bf16.mxu1 %vm284_vm1, %v5209_v28 }
 0x4f5   : > { %7166 = vmatmul.mubr.msk.bf16.vlgmr.msra.gmra.mrb[0].mxu1 %vm284_vm1, %v5210_v30 }
 0x4f6   : > { %7198 = vmatpush3.bf16.msra.mxu1 %v5570_v54  ;;  %7169 = vmatprep.mubr.msk.bf16.mxu1 %vm284_vm1, %v5211_v3 }
 0x4fd   : > { %7170 = vmatmul.mubr.msk.bf16.gmra.mrb[4].mxu1 %vm284_vm1, %v5212_v8 }
 0x4fe   : > { %7173 = vmatprep.mubr.msk.bf16.mxu1 %vm284_vm1, %v5213_v1 }
 0x505   : > { %7174 = vmatmul.mubr.msk.bf16.gmra.mrb[8].mxu1 %vm284_vm1, %v8762_v45  ;;  %v5207_v45 = vld [vmem:[#allocation3 + $0x199] sm:$0xff] }
 0x506   : > { %7177 = vmatprep.mubr.msk.bf16.mxu1 %vm284_vm1, %v8766_v53  ;;  %v5208_v53 = vld [vmem:[#allocation3 + $0x1a1] sm:$0xff] }
 0x50d   : > { %7178 = vmatmul.mubr.msk.bf16.gmra.mrb[12].mxu1 %vm284_vm1, %v8782_v49  ;;  %v5224_v49 = vpack.c.bf16 %v5208_v53, %v5207_v45 }
 0x50e   : > { %7181 = vmatprep.mubr.msk.bf16.mxu1 %vm284_vm1, %v8786_v55  ;;  %v5501_v55 = vld [vmem:[#allocation3 + $0x19a] sm:$0xff] }
 0x515   : > { %7182 = vmatmul.mubr.msk.bf16.gmra.mrb[16].mxu1 %vm284_vm1, %v8802_v47  ;;  %v5502_v47 = vld [vmem:[#allocation3 + $0x1a2] sm:$0xff] }
 0x516   : > { %7185 = vmatprep.mubr.msk.bf16.mxu1 %vm284_vm1, %v8806_v37  ;;  %v5518_v37 = vpack.c.bf16 %v5502_v47, %v5501_v55  ;;  %v9410_v47 = vld [vmem:[#allocation4_spill] sm:$0xff] }
 0x51d   : > { %7186 = vmatmul.mubr.msk.bf16.gmra.mrb[20].mxu1 %vm284_vm1, %v8820_v59  ;;  %v9183_v59 = vld [vmem:[%s9365_s5] ss:$0 sm:$0xff] }
 0x51e   : > { %7189 = vmatprep.mubr.msk.bf16.mxu1 %vm284_vm1, %v8822_v60  ;;  %v9188_v60 = vld [vmem:[%s9366_s6] ss:$0 sm:$0xff] }
 0x525   : > { %7190 = vmatmul.mubr.msk.bf16.gmra.mrb[24].mxu1 %vm284_vm1, %v8828_v57 }
 0x526   : > { %7193 = vmatprep.mubr.msk.bf16.mxu1 %vm284_vm1, %v9043_v29 }
 0x52d   : > { %7194 = vmatmul.mubr.msk.bf16.gmra.mrb[28].mxu1 %vm284_vm1, %v5224_v49 }
 0x52e   : > { %7199 = vmatprep.mubr.msk.bf16.mxu1 %vm284_vm1, %v8907_v2 }
 0x535   : > { %7200 = vmatmul.mubr.msk.bf16.vlgmr.msra.gmra.mrb[0].mxu1 %vm284_vm1, %v8917_v62 }
 0x536   : > { %7203 = vmatprep.mubr.msk.bf16.mxu1 %vm284_vm1, %v8919_v34 }
 0x53d   : > { %7204 = vmatmul.mubr.msk.bf16.gmra.mrb[4].mxu1 %vm284_vm1, %v8925_v16 }
 0x53e   : > { %7207 = vmatprep.mubr.msk.bf16.mxu1 %vm284_vm1, %v8927_v7 }
 0x545   : > { %7208 = vmatmul.mubr.msk.bf16.gmra.mrb[8].mxu1 %vm284_vm1, %v8933_v32 }
 0x546   : > { %7211 = vmatprep.mubr.msk.bf16.mxu1 %vm284_vm1, %v8935_v44 }
 0x54d   : > { %7212 = vmatmul.mubr.msk.bf16.gmra.mrb[12].mxu1 %vm284_vm1, %v8941_v36 }
 0x54e   : > { %7215 = vmatprep.mubr.msk.bf16.mxu1 %vm284_vm1, %v8943_v46 }
 0x555   : > { %7216 = vmatmul.mubr.msk.bf16.gmra.mrb[16].mxu1 %vm284_vm1, %v8949_v33 }
 0x556   : > { %7219 = vmatprep.mubr.msk.bf16.mxu1 %vm284_vm1, %v8951_v51 }
 0x55d   : > { %7220 = vmatmul.mubr.msk.bf16.gmra.mrb[20].mxu1 %vm284_vm1, %v8957_v35 }
 0x55e   : > { %7223 = vmatprep.mubr.msk.bf16.mxu1 %vm284_vm1, %v8959_v50 }
 0x565   : > { %7224 = vmatmul.mubr.msk.bf16.gmra.mrb[24].mxu1 %vm284_vm1, %v8965_v24 }
 0x566   : > { %7227 = vmatprep.mubr.msk.bf16.mxu1 %vm284_vm1, %v9082_v23 }
 0x56d   : > { %7228 = vmatmul.mubr.msk.bf16.gmra.mrb[28].mxu1 %vm284_vm1, %v5518_v37 }
 0x608   : > { %v7201_v57 = vpop.f32.mrb[0].mxu1 }
 0x609   : > { %v5773_v2 = vmul.f32 %v7201_v57, %v9183_v59  ;;  %v5606_v62 = vpop.f32.mrb[1].mxu1 }
 0x60a   : > { %v5771_v34 = vmul.f32 %v9183_v59, %v5606_v62  ;;  %v7202_v16 = vpop.f32.mrb[2].mxu1 }
 0x60b   : > { %v5811_v7 = vadd.f32 %v9188_v60, %v5773_v2  ;;  %v5774_v32 = vmul.f32 %v7202_v16, %v9183_v59  ;;  %v5609_v44 = vpop.f32.mrb[3].mxu1 }
 0x60c   : > { %v5809_v36 = vadd.f32 %v9188_v60, %v5771_v34  ;;  %v5772_v46 = vmul.f32 %v9183_v59, %v5609_v44 }
 0x60d   : > { %v5843_v33 = vadd.f32 %v5811_v7, %v8076_v6  ;;  %v5812_v51 = vadd.f32 %v9188_v60, %v5774_v32 }
 0x60e   : > { %v5841_v35 = vadd.f32 %v5809_v36, %v8070_v4  ;;  %v5810_v50 = vadd.f32 %v9188_v60, %v5772_v46  ;;  %v9411_v46 = vld [vmem:[#allocation7_spill] sm:$0xff] }
 0x60f   : > { %v5875_v24 = vmax.f32 %v5843_v33, 0.0  ;;  %v5844_v27 = vadd.f32 %v5812_v51, %v8083_v9 }
 0x610   : > { %v5873_v6 = vmax.f32 %v5841_v35, 0.0  ;;  %v5842_v56 = vadd.f32 %v5810_v50, %v8073_v5  ;;  %v7205_v21 = vpop.f32.mrb[4].mxu1  ;;  %v9412_v35 = vld [vmem:[#allocation5_spill] sm:$0xff] }
 0x611   : > { %5907 = vst.msk [vmem:[%s9203_s13 + $0x10] sm:$0xff] %vm284_vm1, %v5875_v24  ;;  %v5876_v29 = vmax.f32 %v5844_v27, 0.0  ;;  %v5777_v43 = vmul.f32 %v7205_v21, %v9183_v59  ;;  %v5622_v48 = vpop.f32.mrb[5].mxu1 }
 0x612   : > { %5905 = vst.msk [vmem:[%s9203_s13] sm:$0xff] %vm284_vm1, %v5873_v6  ;;  %v5874_v61 = vmax.f32 %v5842_v56, 0.0  ;;  %v5775_v4 = vmul.f32 %v9183_v59, %v5622_v48  ;;  %v7206_v10 = vpop.f32.mrb[6].mxu1  ;;  %v9413_v6 = vld [vmem:[#allocation8_spill] sm:$0xff] }
 0x613   : > { %5908 = vst.msk [vmem:[%s9203_s13 + $0x18] sm:$0xff] %vm284_vm1, %v5876_v29  ;;  %v5815_v9 = vadd.f32 %v9188_v60, %v5777_v43  ;;  %v5778_v5 = vmul.f32 %v7206_v10, %v9183_v59  ;;  %v5625_v23 = vpop.f32.mrb[7].mxu1  ;;  %v9414_v29 = vld [vmem:[#allocation6_spill] sm:$0xff] }
 0x614   : > { %5906 = vst.msk [vmem:[%s9203_s13 + $0x8] sm:$0xff] %vm284_vm1, %v5874_v61  ;;  %v5813_v20 = vadd.f32 %v9188_v60, %v5775_v4  ;;  %v5776_v25 = vmul.f32 %v9183_v59, %v5625_v23 }
 0x615   : > { %v5847_v26 = vadd.f32 %v5815_v9, %v8096_v13  ;;  %v5816_v31 = vadd.f32 %v9188_v60, %v5778_v5 }
 0x616   : > { %v5845_v42 = vadd.f32 %v5813_v20, %v8090_v11  ;;  %v5814_v63 = vadd.f32 %v9188_v60, %v5776_v25 }
 0x617   : > { %v5879_v52 = vmax.f32 %v5847_v26, 0.0  ;;  %v5848_v28 = vadd.f32 %v5816_v31, %v8103_v14 }
 0x618   : > { %v5877_v39 = vmax.f32 %v5845_v42, 0.0  ;;  %v5846_v38 = vadd.f32 %v5814_v63, %v8093_v12  ;;  %v7209_v41 = vpop.f32.mrb[8].mxu1  ;;  %v9415_v63 = vld [vmem:[#allocation11_spill] sm:$0xff] }
 0x619   : > { %5911 = vst.msk [vmem:[%s9203_s13 + $0x30] sm:$0xff] %vm284_vm1, %v5879_v52  ;;  %v5880_v30 = vmax.f32 %v5848_v28, 0.0  ;;  %v5781_v13 = vmul.f32 %v7209_v41, %v9183_v59  ;;  %v5638_v54 = vpop.f32.mrb[9].mxu1 }
 0x61a   : > { %5909 = vst.msk [vmem:[%s9203_s13 + $0x20] sm:$0xff] %vm284_vm1, %v5877_v39  ;;  %v5878_v22 = vmax.f32 %v5846_v38, 0.0  ;;  %v5779_v11 = vmul.f32 %v9183_v59, %v5638_v54  ;;  %v7210_v3 = vpop.f32.mrb[10].mxu1  ;;  %v9416_v39 = vld [vmem:[#allocation9_spill] sm:$0xff] }
 0x61b   : > { %5912 = vst.msk [vmem:[%s9203_s13 + $0x38] sm:$0xff] %vm284_vm1, %v5880_v30  ;;  %v5819_v14 = vadd.f32 %v9188_v60, %v5781_v13  ;;  %v5782_v12 = vmul.f32 %v7210_v3, %v9183_v59  ;;  %v5641_v40 = vpop.f32.mrb[11].mxu1  ;;  %v9417_v13 = vld [vmem:[#allocation12_spill] sm:$0xff] }
 0x61c   : > { %5910 = vst.msk [vmem:[%s9203_s13 + $0x28] sm:$0xff] %vm284_vm1, %v5878_v22  ;;  %v5817_v58 = vadd.f32 %v9188_v60, %v5779_v11  ;;  %v5780_v19 = vmul.f32 %v9183_v59, %v5641_v40  ;;  %v9418_v11 = vld [vmem:[#allocation10_spill] sm:$0xff] }
 0x61d   : > { %v5851_v8 = vadd.f32 %v5819_v14, %v8121_v17  ;;  %v5820_v0 = vadd.f32 %v9188_v60, %v5782_v12 }
 0x61e   : > { %v5849_v1 = vadd.f32 %v5817_v58, %v8108_v15  ;;  %v5818_v45 = vadd.f32 %v9188_v60, %v5780_v19 }
 0x61f   : > { %v5883_v53 = vmax.f32 %v5851_v8, 0.0  ;;  %v5852_v49 = vadd.f32 %v5820_v0, %v8124_v18 }
 0x620   : > { %v5881_v55 = vmax.f32 %v5849_v1, 0.0  ;;  %v5850_v37 = vadd.f32 %v5818_v45, %v9410_v47  ;;  %v7213_v57 = vpop.f32.mrb[12].mxu1  ;;  %v9419_v47 = vld [vmem:[#allocation15_spill] sm:$0xff] }
 0x621   : > { %5915 = vst.msk [vmem:[%s9203_s13 + $0x50] sm:$0xff] %vm284_vm1, %v5883_v53  ;;  %v5884_v2 = vmax.f32 %v5852_v49, 0.0  ;;  %v5785_v17 = vmul.f32 %v7213_v57, %v9183_v59  ;;  %v5654_v62 = vpop.f32.mrb[13].mxu1 }
 0x622   : > { %5913 = vst.msk [vmem:[%s9203_s13 + $0x40] sm:$0xff] %vm284_vm1, %v5881_v55  ;;  %v5882_v34 = vmax.f32 %v5850_v37, 0.0  ;;  %v5783_v15 = vmul.f32 %v9183_v59, %v5654_v62  ;;  %v7214_v16 = vpop.f32.mrb[14].mxu1 }
 0x623   : > { %5916 = vst.msk [vmem:[%s9203_s13 + $0x58] sm:$0xff] %vm284_vm1, %v5884_v2  ;;  %v5823_v18 = vadd.f32 %v9188_v60, %v5785_v17  ;;  %v5786_v7 = vmul.f32 %v7214_v16, %v9183_v59  ;;  %v5657_v32 = vpop.f32.mrb[15].mxu1  ;;  %v9420_v2 = vld [vmem:[#allocation13_spill] sm:$0xff] }
 0x624   : > { %5914 = vst.msk [vmem:[%s9203_s13 + $0x48] sm:$0xff] %vm284_vm1, %v5882_v34  ;;  %v5821_v44 = vadd.f32 %v9188_v60, %v5783_v15  ;;  %v5784_v36 = vmul.f32 %v9183_v59, %v5657_v32  ;;  %v9421_v15 = vld [vmem:[#allocation16_spill] sm:$0xff] }
 0x625   : > { %v5855_v33 = vadd.f32 %v5823_v18, %v9411_v46  ;;  %v5824_v51 = vadd.f32 %v9188_v60, %v5786_v7  ;;  %v9422_v7 = vld [vmem:[#allocation14_spill] sm:$0xff] }
 0x626   : > { %v5853_v50 = vadd.f32 %v5821_v44, %v9412_v35  ;;  %v5822_v24 = vadd.f32 %v9188_v60, %v5784_v36 }
 0x627   : > { %v5887_v27 = vmax.f32 %v5855_v33, 0.0  ;;  %v5856_v56 = vadd.f32 %v5824_v51, %v9413_v6 }
 0x628   : > { %v5885_v21 = vmax.f32 %v5853_v50, 0.0  ;;  %v5854_v43 = vadd.f32 %v5822_v24, %v9414_v29  ;;  %v7217_v48 = vpop.f32.mrb[16].mxu1  ;;  %v9423_v29 = vld [vmem:[#allocation19_spill] sm:$0xff] }
 0x629   : > { %5919 = vst.msk [vmem:[%s9203_s13 + $0x70] sm:$0xff] %vm284_vm1, %v5887_v27  ;;  %v5888_v61 = vmax.f32 %v5856_v56, 0.0  ;;  %v5789_v4 = vmul.f32 %v7217_v48, %v9183_v59  ;;  %v5670_v10 = vpop.f32.mrb[17].mxu1 }
 0x62a   : > { %5917 = vst.msk [vmem:[%s9203_s13 + $0x60] sm:$0xff] %vm284_vm1, %v5885_v21  ;;  %v5886_v9 = vmax.f32 %v5854_v43, 0.0  ;;  %v5787_v5 = vmul.f32 %v9183_v59, %v5670_v10  ;;  %v7218_v23 = vpop.f32.mrb[18].mxu1 }
 0x62b   : > { %5920 = vst.msk [vmem:[%s9203_s13 + $0x78] sm:$0xff] %vm284_vm1, %v5888_v61  ;;  %v5827_v20 = vadd.f32 %v9188_v60, %v5789_v4  ;;  %v5790_v25 = vmul.f32 %v7218_v23, %v9183_v59  ;;  %v5673_v26 = vpop.f32.mrb[19].mxu1  ;;  %v9424_v61 = vld [vmem:[#allocation17_spill] sm:$0xff] }
 0x62c   : > { %5918 = vst.msk [vmem:[%s9203_s13 + $0x68] sm:$0xff] %vm284_vm1, %v5886_v9  ;;  %v5825_v31 = vadd.f32 %v9188_v60, %v5787_v5  ;;  %v5788_v42 = vmul.f32 %v9183_v59, %v5673_v26  ;;  %v9425_v5 = vld [vmem:[#allocation20_spill] sm:$0xff] }
 0x62d   : > { %v5859_v52 = vadd.f32 %v5827_v20, %v9415_v63  ;;  %v5828_v28 = vadd.f32 %v9188_v60, %v5790_v25  ;;  %v9426_v25 = vld [vmem:[#allocation18_spill] sm:$0xff] }
 0x62e   : > { %v5857_v38 = vadd.f32 %v5825_v31, %v9416_v39  ;;  %v5826_v41 = vadd.f32 %v9188_v60, %v5788_v42 }
 0x62f   : > { %v5891_v30 = vmax.f32 %v5859_v52, 0.0  ;;  %v5860_v54 = vadd.f32 %v5828_v28, %v9417_v13 }
 0x630   : > { %v5889_v22 = vmax.f32 %v5857_v38, 0.0  ;;  %v5858_v3 = vadd.f32 %v5826_v41, %v9418_v11  ;;  %v7221_v14 = vpop.f32.mrb[20].mxu1  ;;  %v9427_v11 = vld [vmem:[#allocation23_spill] sm:$0xff] }
 0x631   : > { %5923 = vst.msk [vmem:[%s9203_s13 + $0x90] sm:$0xff] %vm284_vm1, %v5891_v30  ;;  %v5892_v12 = vmax.f32 %v5860_v54, 0.0  ;;  %v5793_v40 = vmul.f32 %v7221_v14, %v9183_v59  ;;  %v5686_v58 = vpop.f32.mrb[21].mxu1 }
 0x632   : > { %5921 = vst.msk [vmem:[%s9203_s13 + $0x80] sm:$0xff] %vm284_vm1, %v5889_v22  ;;  %v5890_v19 = vmax.f32 %v5858_v3, 0.0  ;;  %v5791_v8 = vmul.f32 %v9183_v59, %v5686_v58  ;;  %v7222_v0 = vpop.f32.mrb[22].mxu1 }
 0x633   : > { %5924 = vst.msk [vmem:[%s9203_s13 + $0x98] sm:$0xff] %vm284_vm1, %v5892_v12  ;;  %v5831_v1 = vadd.f32 %v9188_v60, %v5793_v40  ;;  %v5794_v45 = vmul.f32 %v7222_v0, %v9183_v59  ;;  %v5689_v53 = vpop.f32.mrb[23].mxu1  ;;  %v9428_v12 = vld [vmem:[#allocation21_spill] sm:$0xff] }
 0x634   : > { %5922 = vst.msk [vmem:[%s9203_s13 + $0x88] sm:$0xff] %vm284_vm1, %v5890_v19  ;;  %v5829_v49 = vadd.f32 %v9188_v60, %v5791_v8  ;;  %v5792_v55 = vmul.f32 %v9183_v59, %v5689_v53  ;;  %v9429_v8 = vld [vmem:[#allocation24_spill] sm:$0xff] }
 0x635   : > { %v5863_v37 = vadd.f32 %v5831_v1, %v9419_v47  ;;  %v5832_v57 = vadd.f32 %v9188_v60, %v5794_v45  ;;  %v9430_v45 = vld [vmem:[#allocation22_spill] sm:$0xff] }
 0x636   : > { %v5861_v17 = vadd.f32 %v5829_v49, %v9420_v2  ;;  %v5830_v62 = vadd.f32 %v9188_v60, %v5792_v55 }
 0x637   : > { %v5895_v34 = vmax.f32 %v5863_v37, 0.0  ;;  %v5864_v16 = vadd.f32 %v5832_v57, %v9421_v15 }
 0x638   : > { %v5893_v18 = vmax.f32 %v5861_v17, 0.0  ;;  %v5862_v32 = vadd.f32 %v5830_v62, %v9422_v7  ;;  %v7225_v44 = vpop.f32.mrb[24].mxu1 }
 0x639   : > { %5927 = vst.msk [vmem:[%s9203_s13 + $0xb0] sm:$0xff] %vm284_vm1, %v5895_v34  ;;  %v5896_v36 = vmax.f32 %v5864_v16, 0.0  ;;  %v5797_v46 = vmul.f32 %v7225_v44, %v9183_v59  ;;  %v5702_v33 = vpop.f32.mrb[25].mxu1 }
 0x63a   : > { %5925 = vst.msk [vmem:[%s9203_s13 + $0xa0] sm:$0xff] %vm284_vm1, %v5893_v18  ;;  %v5894_v51 = vmax.f32 %v5862_v32, 0.0  ;;  %v5795_v35 = vmul.f32 %v9183_v59, %v5702_v33  ;;  %v7226_v50 = vpop.f32.mrb[26].mxu1 }
 0x63b   : > { %5928 = vst.msk [vmem:[%s9203_s13 + $0xb8] sm:$0xff] %vm284_vm1, %v5896_v36  ;;  %v5835_v24 = vadd.f32 %v9188_v60, %v5797_v46  ;;  %v5798_v27 = vmul.f32 %v7226_v50, %v9183_v59  ;;  %v5705_v6 = vpop.f32.mrb[27].mxu1 }
 0x63c   : > { %5926 = vst.msk [vmem:[%s9203_s13 + $0xa8] sm:$0xff] %vm284_vm1, %v5894_v51  ;;  %v5833_v56 = vadd.f32 %v9188_v60, %v5795_v35  ;;  %v5796_v21 = vmul.f32 %v9183_v59, %v5705_v6 }
 0x63d   : > { %v5867_v43 = vadd.f32 %v5835_v24, %v9423_v29  ;;  %v5836_v48 = vadd.f32 %v9188_v60, %v5798_v27 }
 0x63e   : > { %v5865_v4 = vadd.f32 %v5833_v56, %v9424_v61  ;;  %v5834_v10 = vadd.f32 %v9188_v60, %v5796_v21 }
 0x63f   : > { %v5899_v9 = vmax.f32 %v5867_v43, 0.0  ;;  %v5868_v23 = vadd.f32 %v5836_v48, %v9425_v5 }
 0x640   : > { %v5897_v20 = vmax.f32 %v5865_v4, 0.0  ;;  %v5866_v26 = vadd.f32 %v5834_v10, %v9426_v25  ;;  %v7229_v31 = vpop.f32.mrb[28].mxu1 }
 0x641   : > { %5931 = vst.msk [vmem:[%s9203_s13 + $0xd0] sm:$0xff] %vm284_vm1, %v5899_v9  ;;  %v5900_v42 = vmax.f32 %v5868_v23, 0.0  ;;  %v5801_v63 = vmul.f32 %v7229_v31, %v9183_v59  ;;  %v5718_v52 = vpop.f32.mrb[29].mxu1 }
 0x642   : > { %5929 = vst.msk [vmem:[%s9203_s13 + $0xc0] sm:$0xff] %vm284_vm1, %v5897_v20  ;;  %v5898_v28 = vmax.f32 %v5866_v26, 0.0  ;;  %v5799_v39 = vmul.f32 %v9183_v59, %v5718_v52  ;;  %v7230_v38 = vpop.f32.mrb[30].mxu1 }
 0x643   : > { %5932 = vst.msk [vmem:[%s9203_s13 + $0xd8] sm:$0xff] %vm284_vm1, %v5900_v42  ;;  %v5839_v41 = vadd.f32 %v9188_v60, %v5801_v63  ;;  %v5802_v30 = vmul.f32 %v7230_v38, %v9183_v59  ;;  %v5721_v13 = vpop.f32.mrb[31].mxu1 }
 0x644   : > { %5930 = vst.msk [vmem:[%s9203_s13 + $0xc8] sm:$0xff] %vm284_vm1, %v5898_v28  ;;  %v5837_v54 = vadd.f32 %v9188_v60, %v5799_v39  ;;  %v5800_v22 = vmul.f32 %v9183_v59, %v5721_v13 }
 0x645   : > { %v5871_v3 = vadd.f32 %v5839_v41, %v9427_v11  ;;  %v5840_v14 = vadd.f32 %v9188_v60, %v5802_v30 }
 0x646   : > { %v5869_v40 = vadd.f32 %v5837_v54, %v9428_v12  ;;  %v5838_v58 = vadd.f32 %v9188_v60, %v5800_v22 }
 0x647   : > { %v5903_v19 = vmax.f32 %v5871_v3, 0.0  ;;  %v5872_v0 = vadd.f32 %v5840_v14, %v9429_v8 }
 0x648   : > { %v5901_v1 = vmax.f32 %v5869_v40, 0.0  ;;  %v5870_v53 = vadd.f32 %v5838_v58, %v9430_v45 }
 0x649   : > { %5935 = vst.msk [vmem:[%s9203_s13 + $0xf0] sm:$0xff] %vm284_vm1, %v5903_v19  ;;  %v5904_v49 = vmax.f32 %v5872_v0, 0.0 }
 0x64a   : > { %5933 = vst.msk [vmem:[%s9203_s13 + $0xe0] sm:$0xff] %vm284_vm1, %v5901_v1  ;;  %v5902_v59 = vmax.f32 %v5870_v53, 0.0 }
 0x64b   : > { %5936 = vst.msk [vmem:[%s9203_s13 + $0xf8] sm:$0xff] %vm284_vm1, %v5904_v49 }
 0x64c   : > { %5934 = vst.msk [vmem:[%s9203_s13 + $0xe8] sm:$0xff] %vm284_vm1, %v5902_v59 }
 0x64d PF: > { %s17_s24 = sadd.s32 1, %s7776_s24  }
 0x64e   : > { %p14_p4 = scmp.ge.s32.totalorder %s17_s24, 4  }
 0x650   :  { %16 = sbr.rel (!%p14_p4) target bundleno = 1 (0x1), region = 98 }

</bundles_post_ra>
